<compile_context>
chip_gen: v7x
topology: tpu7x:2x2x1
jax: 0.10.0
libtpu: 0.0.40
codegen_flags: <defaults>
</compile_context>

<pallas_src>
import jax
import jax.numpy as jnp
from jax.experimental import pallas as pl
from jax.experimental.pallas import tpu as pltpu

_HIGHEST = jax.lax.Precision.HIGHEST


def _mm(a, b):
    """2-D matmul (bf16 inputs expected), f32 accumulation on the MXU."""
    return jax.lax.dot_general(
        a, b, (((1,), (0,)), ((), ())), preferred_element_type=jnp.float32)


# ----------------------------------------------------------------------------
# Host-side parameter layout helpers (plain JAX, run once outside the kernel).
# ----------------------------------------------------------------------------
def _prep_conv(w_hwio, b, W):
    """Fold dx taps of a 3x3 conv into a banded RHS, stacked over dy along K.

    Returns:
      wstack: (3*W*Cin, W*Cout) bf16, rows grouped [dy=0 | dy=1 | dy=2], with
              wstack[dy*W*Cin + x*Cin+ci, x'*Cout+co] = w[dy, x-x'+1, ci, co]
              when 0 <= x-x'+1 <= 2 else 0 (implicit zero column padding).
      brow : (1, W*Cout) f32 bias tiled along the flattened width axis.
    """
    kh, kw, Cin, Cout = w_hwio.shape
    x = jnp.arange(W)
    xp = jnp.arange(W)
    sel = (x[None, :, None] - xp[None, None, :] + 1
           == jnp.arange(kw)[:, None, None]).astype(w_hwio.dtype)    # (3, W, W)
    wband = jnp.einsum('dxp,hdio->hxipo', sel, w_hwio)               # (3,W,Cin,W,Cout)
    wband = wband.reshape(kh, W * Cin, W * Cout)
    wstack = jnp.concatenate([wband[0], wband[1], wband[2]], axis=0)  # (3*W*Cin, W*Cout)
    brow = jnp.tile(b, (W,)).reshape(1, W * Cout)
    return wstack.astype(jnp.bfloat16), brow.astype(jnp.float32)


def _prep_pool(Hin, Win, C, b_tile):
    """AvgPool2d(k=2,s=2,ceil_mode=True) as left (rows) / right (cols) matmuls.

    ph_stack is block-diagonal over the B_TILE stacked samples. Entries are
    0 / 0.5 / 1.0, all exact in bf16.
    """
    Hout = -(-Hin // 2)
    Wout = -(-Win // 2)
    ph = (jnp.arange(Hin)[None, :] // 2
          == jnp.arange(Hout)[:, None]).astype(jnp.float32)          # (Hout, Hin)
    ph = ph / jnp.sum(ph, axis=1, keepdims=True)
    ph_stack = jnp.kron(jnp.eye(b_tile, dtype=jnp.float32), ph)      # (B*Hout, B*Hin)
    sw = (jnp.arange(Win)[:, None] // 2
          == jnp.arange(Wout)[None, :]).astype(jnp.float32)          # (Win, Wout)
    sw = sw / jnp.sum(sw, axis=0, keepdims=True)
    pw = jnp.kron(sw, jnp.eye(C, dtype=jnp.float32))                 # (Win*C, Wout*C)
    return ph_stack.astype(jnp.bfloat16), pw.astype(jnp.bfloat16), Hout, Wout


def _choose_b_tile(N, H):
    """Largest batch tile that keeps >=2 grid steps (v7x megacore) and M<=256."""
    best = 1
    for bt in range(1, N + 1):
        if N % bt != 0:
            continue
        if N >= 2 and N // bt < 2:
            continue
        if bt * (H + 2) > 256:
            continue
        best = bt
    return best


# ----------------------------------------------------------------------------
# Fused encoder kernel (all blocks, all convs, all pools in one pallas_call).
# ----------------------------------------------------------------------------
def _make_encoder_kernel(conv_meta, block_layout, n_conv, n_pool, b_tile):
    def kernel(*refs):
        # refs = [x, w_0, brow_0, ..., ph_0, pw_0, ..., out, pad_0, ...]
        x_ref = refs[0]
        w_refs = [refs[1 + 2 * l] for l in range(n_conv)]
        b_refs = [refs[2 + 2 * l] for l in range(n_conv)]
        base = 1 + 2 * n_conv
        ph_refs = [refs[base + 2 * p] for p in range(n_pool)]
        pw_refs = [refs[base + 2 * p + 1] for p in range(n_pool)]
        o_ref = refs[base + 2 * n_pool]
        pad_refs = list(refs[base + 2 * n_pool + 1:])

        cur = x_ref[0]                                 # (B*H0, W0*C0) f32

        for pool_idx, conv_idxs in block_layout:
            if pool_idx is not None:
                # AvgPool2d(2,2): two small MXU matmuls (bf16 in, f32 acc).
                t = _mm(cur.astype(jnp.bfloat16), pw_refs[pool_idx][...])
                cur = _mm(ph_refs[pool_idx][...], t.astype(jnp.bfloat16))
            for li in conv_idxs:
                H, W, Cin, Cout = conv_meta[li]
                WC = W * Cin
                pad = pad_refs[li]                     # (B*(H+2), W*Cin) bf16 scratch
                cur_b = cur.astype(jnp.bfloat16)
                zrow = jnp.zeros((1, WC), jnp.bfloat16)
                # Write per-sample interior rows; keep 2 zero border rows per
                # sample (re-zeroed each step: megacore-safe, 2 tiny stores).
                for b in range(b_tile):
                    r0 = b * (H + 2)
                    pad[r0:r0 + 1, :] = zrow
                    pad[r0 + 1:r0 + 1 + H, :] = cur_b[b * H:(b + 1) * H, :]
                    pad[r0 + H + 1:r0 + H + 2, :] = zrow
                # Conv3x3 as ONE matmul: LHS = lane-concat of the 3 dy-shifted
                # views, RHS = 3-band stacked weights.  K = 3*W*Cin, N = W*Cout.
                nrow = b_tile * (H + 2) - 2
                big = jnp.concatenate(
                    [pad[dy:dy + nrow, :] for dy in range(3)], axis=1)
                if b_tile == 1:
                    lhs = big
                else:
                    lhs = jnp.concatenate(
                        [big[b * (H + 2):b * (H + 2) + H, :]
                         for b in range(b_tile)], axis=0)
                acc = _mm(lhs, w_refs[li][...])        # (B*H, W*Cout) f32
                cur = jnp.maximum(acc + b_refs[li][...], 0.0)   # bias + ReLU

        o_ref[0] = cur.astype(o_ref.dtype)

    return kernel


def encoder_forward(x_nhwc, params, b_tile=None):
    """x_nhwc: (N, H, W, Cin) f32; params: list of blocks of (w_hwio, b)."""
    N, H, W, Cin0 = x_nhwc.shape
    dtype = x_nhwc.dtype
    if b_tile is None:
        b_tile = _choose_b_tile(N, H)
    assert N % b_tile == 0
    n_steps = N // b_tile

    conv_meta, block_layout = [], []
    conv_inputs, pool_inputs = [], []

    H_cur, W_cur, C_cur = H, W, Cin0
    li = pi = 0
    for i, block in enumerate(params):
        pool_idx = None
        if i != 0:
            ph, pw, Ho, Wo = _prep_pool(H_cur, W_cur, C_cur, b_tile)
            pool_inputs.append((ph, pw))
            pool_idx = pi
            pi += 1
            H_cur, W_cur = Ho, Wo
        conv_idxs = []
        for (w, b) in block:
            cin, cout = int(w.shape[2]), int(w.shape[3])
            assert cin == C_cur
            wstack, brow = _prep_conv(w.astype(jnp.float32), b.astype(jnp.float32), W_cur)
            conv_inputs.append((wstack, brow))
            conv_meta.append((H_cur, W_cur, cin, cout))
            conv_idxs.append(li)
            li += 1
            C_cur = cout
        block_layout.append((pool_idx, conv_idxs))

    n_conv, n_pool = len(conv_meta), len(pool_inputs)

    # Lane-dense layout: (n_steps, B_TILE*H, W*C) — batch folded into rows (M).
    x3 = x_nhwc.reshape(n_steps, b_tile * H, W * Cin0)

    args = [x3]
    in_specs = [pl.BlockSpec((1, b_tile * H, W * Cin0), lambda n: (n, 0, 0))]
    for wstack, brow in conv_inputs:
        args += [wstack, brow]
        in_specs += [pl.BlockSpec(wstack.shape, lambda n: (0, 0)),
                     pl.BlockSpec(brow.shape, lambda n: (0, 0))]
    for ph, pw in pool_inputs:
        args += [ph, pw]
        in_specs += [pl.BlockSpec(ph.shape, lambda n: (0, 0)),
                     pl.BlockSpec(pw.shape, lambda n: (0, 0))]

    out_H, out_W, out_C = H_cur, W_cur, C_cur
    scratch_shapes = [pltpu.VMEM((b_tile * (h + 2), w * ci), jnp.bfloat16)
                      for (h, w, ci, _) in conv_meta]

    out3 = pl.pallas_call(
        _make_encoder_kernel(conv_meta, block_layout, n_conv, n_pool, b_tile),
        out_shape=jax.ShapeDtypeStruct((n_steps, b_tile * out_H, out_W * out_C), dtype),
        grid=(n_steps,),
        in_specs=in_specs,
        out_specs=pl.BlockSpec((1, b_tile * out_H, out_W * out_C), lambda n: (n, 0, 0)),
        scratch_shapes=scratch_shapes,
        compiler_params=pltpu.CompilerParams(dimension_semantics=("parallel",)),
    )(*args)

    return out3.reshape(N, out_H, out_W, out_C)


# ----------------------------------------------------------------------------
# Parameter init (deterministic, He-style) — same contract as the module.
# ----------------------------------------------------------------------------
def init_encoder_params(key, input_channels, num_filters, no_convs_per_block):
    params = []
    for i, nf in enumerate(num_filters):
        cin = input_channels if i == 0 else num_filters[i - 1]
        dims = [(cin, nf)] + [(nf, nf)] * (no_convs_per_block - 1)
        block = []
        for ci, co in dims:
            key, kw, kb = jax.random.split(key, 3)
            fan_in = 9 * ci
            w = jax.random.normal(kw, (3, 3, ci, co), jnp.float32) * jnp.sqrt(2.0 / fan_in)
            b = 0.1 * jax.random.normal(kb, (co,), jnp.float32)
            block.append((w, b))
        params.append(block)
    return params


# ----------------------------------------------------------------------------
# Pure-JAX f32 reference (correctness check; kernel uses bf16 MXU inputs).
# ----------------------------------------------------------------------------
def _conv_ref(x, w, b):
    y = jax.lax.conv_general_dilated(
        x, w, window_strides=(1, 1), padding="SAME",
        dimension_numbers=("NHWC", "HWIO", "NHWC"), precision=_HIGHEST)
    return jax.nn.relu(y + b)


def _pool_ref(x):
    # Even spatial sizes here, so floor == ceil_mode.
    s = jax.lax.reduce_window(x, 0.0, jax.lax.add, (1, 2, 2, 1), (1, 2, 2, 1), "VALID")
    return s * 0.25


def _encoder_ref(x_nhwc, params):
    out = x_nhwc
    for i, block in enumerate(params):
        if i != 0:
            out = _pool_ref(out)
        for w, b in block:
            out = _conv_ref(out, w, b)
    return out


if __name__ == "__main__":
    key = jax.random.PRNGKey(0)
    kx, kp = jax.random.split(key)

    # Encoder config: input_channels=4, num_filters=[8,16,32],
    # no_convs_per_block=2, padding=True, posterior=False.
    N, C, H, W = 2, 4, 16, 16
    num_filters = [8, 16, 32]
    no_convs_per_block = 2

    x_nchw = jax.random.normal(kx, (N, C, H, W), jnp.float32)   # PyTorch NCHW input
    params = init_encoder_params(kp, C, num_filters, no_convs_per_block)

    x_nhwc = jnp.transpose(x_nchw, (0, 2, 3, 1))
    out_nhwc = jax.block_until_ready(encoder_forward(x_nhwc, params))
    out_nchw = jnp.transpose(out_nhwc, (0, 3, 1, 2))            # NCHW: (2, 32, 4, 4)

    ref_nhwc = _encoder_ref(x_nhwc, params)
    assert out_nchw.shape == (N, num_filters[-1], H // 4, W // 4), out_nchw.shape
    max_err = float(jnp.max(jnp.abs(out_nhwc - ref_nhwc)))
    assert jnp.allclose(out_nhwc, ref_nhwc, rtol=5e-2, atol=5e-2), max_err

    # Also exercise the batch-in-M path (B_TILE > 1, grid still 2 steps).
    x_big = jax.random.normal(jax.random.PRNGKey(1), (8, H, W, C), jnp.float32)
    out_big = jax.block_until_ready(encoder_forward(x_big, params))
    ref_big = _encoder_ref(x_big, params)
    max_err2 = float(jnp.max(jnp.abs(out_big - ref_big)))
    assert jnp.allclose(out_big, ref_big, rtol=5e-2, atol=5e-2), max_err2

    print("KERNEL_OK")
</pallas_src>

<mosaic_0001>
module attributes {stable_mosaic.version = 11 : i64} {
  func.func @kernel(%arg0: i32, %arg1: memref<1x16x64xf32, #tpu.memory_space<vmem>>, %arg2: memref<192x128xbf16, #tpu.memory_space<vmem>>, %arg3: memref<1x128xf32, #tpu.memory_space<vmem>>, %arg4: memref<384x128xbf16, #tpu.memory_space<vmem>>, %arg5: memref<1x128xf32, #tpu.memory_space<vmem>>, %arg6: memref<192x128xbf16, #tpu.memory_space<vmem>>, %arg7: memref<1x128xf32, #tpu.memory_space<vmem>>, %arg8: memref<384x128xbf16, #tpu.memory_space<vmem>>, %arg9: memref<1x128xf32, #tpu.memory_space<vmem>>, %arg10: memref<192x128xbf16, #tpu.memory_space<vmem>>, %arg11: memref<1x128xf32, #tpu.memory_space<vmem>>, %arg12: memref<384x128xbf16, #tpu.memory_space<vmem>>, %arg13: memref<1x128xf32, #tpu.memory_space<vmem>>, %arg14: memref<8x16xbf16, #tpu.memory_space<vmem>>, %arg15: memref<128x64xbf16, #tpu.memory_space<vmem>>, %arg16: memref<4x8xbf16, #tpu.memory_space<vmem>>, %arg17: memref<128x64xbf16, #tpu.memory_space<vmem>>, %arg18: memref<1x4x128xf32, #tpu.memory_space<vmem>>, %arg19: memref<18x64xbf16, #tpu.memory_space<vmem>>, %arg20: memref<18x128xbf16, #tpu.memory_space<vmem>>, %arg21: memref<10x64xbf16, #tpu.memory_space<vmem>>, %arg22: memref<10x128xbf16, #tpu.memory_space<vmem>>, %arg23: memref<6x64xbf16, #tpu.memory_space<vmem>>, %arg24: memref<6x128xbf16, #tpu.memory_space<vmem>>) attributes {dimension_semantics = [#tpu.dimension_semantics<parallel>], iteration_bounds = array<i64: 2>, scalar_prefetch = 0 : i64, scratch_operands = 6 : i64, tpu.core_type = #tpu.core_type<tc>, window_params = [{transform_indices = @transform_0, window_bounds = array<i64: 1, 16, 64>}, {pipeline_mode = #tpu.pipeline_mode<synchronous>, transform_indices = @transform_1, window_bounds = array<i64: 192, 128>}, {pipeline_mode = #tpu.pipeline_mode<synchronous>, transform_indices = @transform_2, window_bounds = array<i64: 1, 128>}, {pipeline_mode = #tpu.pipeline_mode<synchronous>, transform_indices = @transform_3, window_bounds = array<i64: 384, 128>}, {pipeline_mode = #tpu.pipeline_mode<synchronous>, transform_indices = @transform_4, window_bounds = array<i64: 1, 128>}, {pipeline_mode = #tpu.pipeline_mode<synchronous>, transform_indices = @transform_5, window_bounds = array<i64: 192, 128>}, {pipeline_mode = #tpu.pipeline_mode<synchronous>, transform_indices = @transform_6, window_bounds = array<i64: 1, 128>}, {pipeline_mode = #tpu.pipeline_mode<synchronous>, transform_indices = @transform_7, window_bounds = array<i64: 384, 128>}, {pipeline_mode = #tpu.pipeline_mode<synchronous>, transform_indices = @transform_8, window_bounds = array<i64: 1, 128>}, {pipeline_mode = #tpu.pipeline_mode<synchronous>, transform_indices = @transform_9, window_bounds = array<i64: 192, 128>}, {pipeline_mode = #tpu.pipeline_mode<synchronous>, transform_indices = @transform_10, window_bounds = array<i64: 1, 128>}, {pipeline_mode = #tpu.pipeline_mode<synchronous>, transform_indices = @transform_11, window_bounds = array<i64: 384, 128>}, {pipeline_mode = #tpu.pipeline_mode<synchronous>, transform_indices = @transform_12, window_bounds = array<i64: 1, 128>}, {pipeline_mode = #tpu.pipeline_mode<synchronous>, transform_indices = @transform_13, window_bounds = array<i64: 8, 16>}, {pipeline_mode = #tpu.pipeline_mode<synchronous>, transform_indices = @transform_14, window_bounds = array<i64: 128, 64>}, {pipeline_mode = #tpu.pipeline_mode<synchronous>, transform_indices = @transform_15, window_bounds = array<i64: 4, 8>}, {pipeline_mode = #tpu.pipeline_mode<synchronous>, transform_indices = @transform_16, window_bounds = array<i64: 128, 64>}, {transform_indices = @transform_17, window_bounds = array<i64: 1, 4, 128>}]} {
    %c0 = arith.constant 0 : index
    %c0_0 = arith.constant 0 : index
    %c0_1 = arith.constant 0 : index
    %0 = vector.load %arg1[%c0, %c0_0, %c0_1] : memref<1x16x64xf32, #tpu.memory_space<vmem>>, vector<1x16x64xf32>
    %1 = vector.shape_cast %0 : vector<1x16x64xf32> to vector<16x64xf32>
    %2 = arith.truncf %1 : vector<16x64xf32> to vector<16x64xbf16>
    %cst = arith.constant 0.000000e+00 : bf16
    %3 = vector.broadcast %cst : bf16 to vector<1x64xbf16>
    %c0_2 = arith.constant 0 : index
    %c0_3 = arith.constant 0 : index
    %4 = vector.load %arg19[%c0_2, %c0_3] : memref<18x64xbf16, #tpu.memory_space<vmem>>, vector<1x64xbf16>
    tpu.vector_store %arg19[%c0_2, %c0_3], %3 {strides = array<i32>} : memref<18x64xbf16, #tpu.memory_space<vmem>>, vector<1x64xbf16>,
    %c1 = arith.constant 1 : index
    %c0_4 = arith.constant 0 : index
    %5 = vector.load %arg19[%c1, %c0_4] : memref<18x64xbf16, #tpu.memory_space<vmem>>, vector<16x64xbf16>
    tpu.vector_store %arg19[%c1, %c0_4], %2 {strides = array<i32>} : memref<18x64xbf16, #tpu.memory_space<vmem>>, vector<16x64xbf16>,
    %c17 = arith.constant 17 : index
    %c0_5 = arith.constant 0 : index
    %6 = vector.load %arg19[%c17, %c0_5] : memref<18x64xbf16, #tpu.memory_space<vmem>>, vector<1x64xbf16>
    tpu.vector_store %arg19[%c17, %c0_5], %3 {strides = array<i32>} : memref<18x64xbf16, #tpu.memory_space<vmem>>, vector<1x64xbf16>,
    %c0_6 = arith.constant 0 : index
    %c0_7 = arith.constant 0 : index
    %7 = vector.load %arg19[%c0_6, %c0_7] : memref<18x64xbf16, #tpu.memory_space<vmem>>, vector<16x64xbf16>
    %c1_8 = arith.constant 1 : index
    %c0_9 = arith.constant 0 : index
    %8 = vector.load %arg19[%c1_8, %c0_9] : memref<18x64xbf16, #tpu.memory_space<vmem>>, vector<16x64xbf16>
    %c2 = arith.constant 2 : index
    %c0_10 = arith.constant 0 : index
    %9 = vector.load %arg19[%c2, %c0_10] : memref<18x64xbf16, #tpu.memory_space<vmem>>, vector<16x64xbf16>
    %10 = tpu.concatenate %7, %8, %9 in 1 : vector<16x64xbf16>, vector<16x64xbf16>, vector<16x64xbf16> -> vector<16x192xbf16>
    %c0_11 = arith.constant 0 : index
    %c0_12 = arith.constant 0 : index
    %11 = vector.load %arg2[%c0_11, %c0_12] : memref<192x128xbf16, #tpu.memory_space<vmem>>, vector<192x128xbf16>
    %cst_13 = arith.constant dense<0.000000e+00> : vector<16x128xf32>
    %12 = tpu.matmul %10, %11, %cst_13 {dimension_numbers = #tpu.dot_dimension_numbers<[1], [0], [0], [1], [0, 0, 1, 1], [], []>} : vector<16x192xbf16>, vector<192x128xbf16>, vector<16x128xf32> -> vector<16x128xf32>
    %c0_14 = arith.constant 0 : index
    %c0_15 = arith.constant 0 : index
    %13 = vector.load %arg3[%c0_14, %c0_15] : memref<1x128xf32, #tpu.memory_space<vmem>>, vector<1x128xf32>
    %14 = vector.broadcast %13 : vector<1x128xf32> to vector<16x128xf32>
    %15 = arith.addf %12, %14 : vector<16x128xf32>
    %cst_16 = arith.constant 0.000000e+00 : f32
    %16 = vector.broadcast %cst_16 : f32 to vector<16x128xf32>
    %17 = arith.maximumf %15, %16 : vector<16x128xf32>
    %18 = arith.truncf %17 : vector<16x128xf32> to vector<16x128xbf16>
    %cst_17 = arith.constant 0.000000e+00 : bf16
    %19 = vector.broadcast %cst_17 : bf16 to vector<1x128xbf16>
    %c0_18 = arith.constant 0 : index
    %c0_19 = arith.constant 0 : index
    %20 = vector.load %arg20[%c0_18, %c0_19] : memref<18x128xbf16, #tpu.memory_space<vmem>>, vector<1x128xbf16>
    tpu.vector_store %arg20[%c0_18, %c0_19], %19 {strides = array<i32>} : memref<18x128xbf16, #tpu.memory_space<vmem>>, vector<1x128xbf16>,
    %c1_20 = arith.constant 1 : index
    %c0_21 = arith.constant 0 : index
    %21 = vector.load %arg20[%c1_20, %c0_21] : memref<18x128xbf16, #tpu.memory_space<vmem>>, vector<16x128xbf16>
    tpu.vector_store %arg20[%c1_20, %c0_21], %18 {strides = array<i32>} : memref<18x128xbf16, #tpu.memory_space<vmem>>, vector<16x128xbf16>,
    %c17_22 = arith.constant 17 : index
    %c0_23 = arith.constant 0 : index
    %22 = vector.load %arg20[%c17_22, %c0_23] : memref<18x128xbf16, #tpu.memory_space<vmem>>, vector<1x128xbf16>
    tpu.vector_store %arg20[%c17_22, %c0_23], %19 {strides = array<i32>} : memref<18x128xbf16, #tpu.memory_space<vmem>>, vector<1x128xbf16>,
    %c0_24 = arith.constant 0 : index
    %c0_25 = arith.constant 0 : index
    %23 = vector.load %arg20[%c0_24, %c0_25] : memref<18x128xbf16, #tpu.memory_space<vmem>>, vector<16x128xbf16>
    %c1_26 = arith.constant 1 : index
    %c0_27 = arith.constant 0 : index
    %24 = vector.load %arg20[%c1_26, %c0_27] : memref<18x128xbf16, #tpu.memory_space<vmem>>, vector<16x128xbf16>
    %c2_28 = arith.constant 2 : index
    %c0_29 = arith.constant 0 : index
    %25 = vector.load %arg20[%c2_28, %c0_29] : memref<18x128xbf16, #tpu.memory_space<vmem>>, vector<16x128xbf16>
    %26 = tpu.concatenate %23, %24, %25 in 1 : vector<16x128xbf16>, vector<16x128xbf16>, vector<16x128xbf16> -> vector<16x384xbf16>
    %c0_30 = arith.constant 0 : index
    %c0_31 = arith.constant 0 : index
    %27 = vector.load %arg4[%c0_30, %c0_31] : memref<384x128xbf16, #tpu.memory_space<vmem>>, vector<384x128xbf16>
    %cst_32 = arith.constant dense<0.000000e+00> : vector<16x128xf32>
    %28 = tpu.matmul %26, %27, %cst_32 {dimension_numbers = #tpu.dot_dimension_numbers<[1], [0], [0], [1], [0, 0, 1, 1], [], []>} : vector<16x384xbf16>, vector<384x128xbf16>, vector<16x128xf32> -> vector<16x128xf32>
    %c0_33 = arith.constant 0 : index
    %c0_34 = arith.constant 0 : index
    %29 = vector.load %arg5[%c0_33, %c0_34] : memref<1x128xf32, #tpu.memory_space<vmem>>, vector<1x128xf32>
    %30 = vector.broadcast %29 : vector<1x128xf32> to vector<16x128xf32>
    %31 = arith.addf %28, %30 : vector<16x128xf32>
    %cst_35 = arith.constant 0.000000e+00 : f32
    %32 = vector.broadcast %cst_35 : f32 to vector<16x128xf32>
    %33 = arith.maximumf %31, %32 : vector<16x128xf32>
    %34 = arith.truncf %33 : vector<16x128xf32> to vector<16x128xbf16>
    %c0_36 = arith.constant 0 : index
    %c0_37 = arith.constant 0 : index
    %35 = vector.load %arg15[%c0_36, %c0_37] : memref<128x64xbf16, #tpu.memory_space<vmem>>, vector<128x64xbf16>
    %cst_38 = arith.constant dense<0.000000e+00> : vector<16x64xf32>
    %36 = tpu.matmul %34, %35, %cst_38 {dimension_numbers = #tpu.dot_dimension_numbers<[1], [0], [0], [1], [0, 0, 1, 1], [], []>} : vector<16x128xbf16>, vector<128x64xbf16>, vector<16x64xf32> -> vector<16x64xf32>
    %c0_39 = arith.constant 0 : index
    %c0_40 = arith.constant 0 : index
    %37 = vector.load %arg14[%c0_39, %c0_40] : memref<8x16xbf16, #tpu.memory_space<vmem>>, vector<8x16xbf16>
    %38 = arith.truncf %36 : vector<16x64xf32> to vector<16x64xbf16>
    %cst_41 = arith.constant dense<0.000000e+00> : vector<8x64xf32>
    %39 = tpu.matmul %37, %38, %cst_41 {dimension_numbers = #tpu.dot_dimension_numbers<[1], [0], [0], [1], [0, 0, 1, 1], [], []>} : vector<8x16xbf16>, vector<16x64xbf16>, vector<8x64xf32> -> vector<8x64xf32>
    %40 = arith.truncf %39 : vector<8x64xf32> to vector<8x64xbf16>
    %cst_42 = arith.constant 0.000000e+00 : bf16
    %41 = vector.broadcast %cst_42 : bf16 to vector<1x64xbf16>
    %c0_43 = arith.constant 0 : index
    %c0_44 = arith.constant 0 : index
    %42 = vector.load %arg21[%c0_43, %c0_44] : memref<10x64xbf16, #tpu.memory_space<vmem>>, vector<1x64xbf16>
    tpu.vector_store %arg21[%c0_43, %c0_44], %41 {strides = array<i32>} : memref<10x64xbf16, #tpu.memory_space<vmem>>, vector<1x64xbf16>,
    %c1_45 = arith.constant 1 : index
    %c0_46 = arith.constant 0 : index
    %43 = vector.load %arg21[%c1_45, %c0_46] : memref<10x64xbf16, #tpu.memory_space<vmem>>, vector<8x64xbf16>
    tpu.vector_store %arg21[%c1_45, %c0_46], %40 {strides = array<i32>} : memref<10x64xbf16, #tpu.memory_space<vmem>>, vector<8x64xbf16>,
    %c9 = arith.constant 9 : index
    %c0_47 = arith.constant 0 : index
    %44 = vector.load %arg21[%c9, %c0_47] : memref<10x64xbf16, #tpu.memory_space<vmem>>, vector<1x64xbf16>
    tpu.vector_store %arg21[%c9, %c0_47], %41 {strides = array<i32>} : memref<10x64xbf16, #tpu.memory_space<vmem>>, vector<1x64xbf16>,
    %c0_48 = arith.constant 0 : index
    %c0_49 = arith.constant 0 : index
    %45 = vector.load %arg21[%c0_48, %c0_49] : memref<10x64xbf16, #tpu.memory_space<vmem>>, vector<8x64xbf16>
    %c1_50 = arith.constant 1 : index
    %c0_51 = arith.constant 0 : index
    %46 = vector.load %arg21[%c1_50, %c0_51] : memref<10x64xbf16, #tpu.memory_space<vmem>>, vector<8x64xbf16>
    %c2_52 = arith.constant 2 : index
    %c0_53 = arith.constant 0 : index
    %47 = vector.load %arg21[%c2_52, %c0_53] : memref<10x64xbf16, #tpu.memory_space<vmem>>, vector<8x64xbf16>
    %48 = tpu.concatenate %45, %46, %47 in 1 : vector<8x64xbf16>, vector<8x64xbf16>, vector<8x64xbf16> -> vector<8x192xbf16>
    %c0_54 = arith.constant 0 : index
    %c0_55 = arith.constant 0 : index
    %49 = vector.load %arg6[%c0_54, %c0_55] : memref<192x128xbf16, #tpu.memory_space<vmem>>, vector<192x128xbf16>
    %cst_56 = arith.constant dense<0.000000e+00> : vector<8x128xf32>
    %50 = tpu.matmul %48, %49, %cst_56 {dimension_numbers = #tpu.dot_dimension_numbers<[1], [0], [0], [1], [0, 0, 1, 1], [], []>} : vector<8x192xbf16>, vector<192x128xbf16>, vector<8x128xf32> -> vector<8x128xf32>
    %c0_57 = arith.constant 0 : index
    %c0_58 = arith.constant 0 : index
    %51 = vector.load %arg7[%c0_57, %c0_58] : memref<1x128xf32, #tpu.memory_space<vmem>>, vector<1x128xf32>
    %52 = vector.broadcast %51 : vector<1x128xf32> to vector<8x128xf32>
    %53 = arith.addf %50, %52 : vector<8x128xf32>
    %cst_59 = arith.constant 0.000000e+00 : f32
    %54 = vector.broadcast %cst_59 : f32 to vector<8x128xf32>
    %55 = arith.maximumf %53, %54 : vector<8x128xf32>
    %56 = arith.truncf %55 : vector<8x128xf32> to vector<8x128xbf16>
    %cst_60 = arith.constant 0.000000e+00 : bf16
    %57 = vector.broadcast %cst_60 : bf16 to vector<1x128xbf16>
    %c0_61 = arith.constant 0 : index
    %c0_62 = arith.constant 0 : index
    %58 = vector.load %arg22[%c0_61, %c0_62] : memref<10x128xbf16, #tpu.memory_space<vmem>>, vector<1x128xbf16>
    tpu.vector_store %arg22[%c0_61, %c0_62], %57 {strides = array<i32>} : memref<10x128xbf16, #tpu.memory_space<vmem>>, vector<1x128xbf16>,
    %c1_63 = arith.constant 1 : index
    %c0_64 = arith.constant 0 : index
    %59 = vector.load %arg22[%c1_63, %c0_64] : memref<10x128xbf16, #tpu.memory_space<vmem>>, vector<8x128xbf16>
    tpu.vector_store %arg22[%c1_63, %c0_64], %56 {strides = array<i32>} : memref<10x128xbf16, #tpu.memory_space<vmem>>, vector<8x128xbf16>,
    %c9_65 = arith.constant 9 : index
    %c0_66 = arith.constant 0 : index
    %60 = vector.load %arg22[%c9_65, %c0_66] : memref<10x128xbf16, #tpu.memory_space<vmem>>, vector<1x128xbf16>
    tpu.vector_store %arg22[%c9_65, %c0_66], %57 {strides = array<i32>} : memref<10x128xbf16, #tpu.memory_space<vmem>>, vector<1x128xbf16>,
    %c0_67 = arith.constant 0 : index
    %c0_68 = arith.constant 0 : index
    %61 = vector.load %arg22[%c0_67, %c0_68] : memref<10x128xbf16, #tpu.memory_space<vmem>>, vector<8x128xbf16>
    %c1_69 = arith.constant 1 : index
    %c0_70 = arith.constant 0 : index
    %62 = vector.load %arg22[%c1_69, %c0_70] : memref<10x128xbf16, #tpu.memory_space<vmem>>, vector<8x128xbf16>
    %c2_71 = arith.constant 2 : index
    %c0_72 = arith.constant 0 : index
    %63 = vector.load %arg22[%c2_71, %c0_72] : memref<10x128xbf16, #tpu.memory_space<vmem>>, vector<8x128xbf16>
    %64 = tpu.concatenate %61, %62, %63 in 1 : vector<8x128xbf16>, vector<8x128xbf16>, vector<8x128xbf16> -> vector<8x384xbf16>
    %c0_73 = arith.constant 0 : index
    %c0_74 = arith.constant 0 : index
    %65 = vector.load %arg8[%c0_73, %c0_74] : memref<384x128xbf16, #tpu.memory_space<vmem>>, vector<384x128xbf16>
    %cst_75 = arith.constant dense<0.000000e+00> : vector<8x128xf32>
    %66 = tpu.matmul %64, %65, %cst_75 {dimension_numbers = #tpu.dot_dimension_numbers<[1], [0], [0], [1], [0, 0, 1, 1], [], []>} : vector<8x384xbf16>, vector<384x128xbf16>, vector<8x128xf32> -> vector<8x128xf32>
    %c0_76 = arith.constant 0 : index
    %c0_77 = arith.constant 0 : index
    %67 = vector.load %arg9[%c0_76, %c0_77] : memref<1x128xf32, #tpu.memory_space<vmem>>, vector<1x128xf32>
    %68 = vector.broadcast %67 : vector<1x128xf32> to vector<8x128xf32>
    %69 = arith.addf %66, %68 : vector<8x128xf32>
    %cst_78 = arith.constant 0.000000e+00 : f32
    %70 = vector.broadcast %cst_78 : f32 to vector<8x128xf32>
    %71 = arith.maximumf %69, %70 : vector<8x128xf32>
    %72 = arith.truncf %71 : vector<8x128xf32> to vector<8x128xbf16>
    %c0_79 = arith.constant 0 : index
    %c0_80 = arith.constant 0 : index
    %73 = vector.load %arg17[%c0_79, %c0_80] : memref<128x64xbf16, #tpu.memory_space<vmem>>, vector<128x64xbf16>
    %cst_81 = arith.constant dense<0.000000e+00> : vector<8x64xf32>
    %74 = tpu.matmul %72, %73, %cst_81 {dimension_numbers = #tpu.dot_dimension_numbers<[1], [0], [0], [1], [0, 0, 1, 1], [], []>} : vector<8x128xbf16>, vector<128x64xbf16>, vector<8x64xf32> -> vector<8x64xf32>
    %c0_82 = arith.constant 0 : index
    %c0_83 = arith.constant 0 : index
    %75 = vector.load %arg16[%c0_82, %c0_83] : memref<4x8xbf16, #tpu.memory_space<vmem>>, vector<4x8xbf16>
    %76 = arith.truncf %74 : vector<8x64xf32> to vector<8x64xbf16>
    %cst_84 = arith.constant dense<0.000000e+00> : vector<4x64xf32>
    %77 = tpu.matmul %75, %76, %cst_84 {dimension_numbers = #tpu.dot_dimension_numbers<[1], [0], [0], [1], [0, 0, 1, 1], [], []>} : vector<4x8xbf16>, vector<8x64xbf16>, vector<4x64xf32> -> vector<4x64xf32>
    %78 = arith.truncf %77 : vector<4x64xf32> to vector<4x64xbf16>
    %cst_85 = arith.constant 0.000000e+00 : bf16
    %79 = vector.broadcast %cst_85 : bf16 to vector<1x64xbf16>
    %c0_86 = arith.constant 0 : index
    %c0_87 = arith.constant 0 : index
    %80 = vector.load %arg23[%c0_86, %c0_87] : memref<6x64xbf16, #tpu.memory_space<vmem>>, vector<1x64xbf16>
    tpu.vector_store %arg23[%c0_86, %c0_87], %79 {strides = array<i32>} : memref<6x64xbf16, #tpu.memory_space<vmem>>, vector<1x64xbf16>,
    %c1_88 = arith.constant 1 : index
    %c0_89 = arith.constant 0 : index
    %81 = vector.load %arg23[%c1_88, %c0_89] : memref<6x64xbf16, #tpu.memory_space<vmem>>, vector<4x64xbf16>
    tpu.vector_store %arg23[%c1_88, %c0_89], %78 {strides = array<i32>} : memref<6x64xbf16, #tpu.memory_space<vmem>>, vector<4x64xbf16>,
    %c5 = arith.constant 5 : index
    %c0_90 = arith.constant 0 : index
    %82 = vector.load %arg23[%c5, %c0_90] : memref<6x64xbf16, #tpu.memory_space<vmem>>, vector<1x64xbf16>
    tpu.vector_store %arg23[%c5, %c0_90], %79 {strides = array<i32>} : memref<6x64xbf16, #tpu.memory_space<vmem>>, vector<1x64xbf16>,
    %c0_91 = arith.constant 0 : index
    %c0_92 = arith.constant 0 : index
    %83 = vector.load %arg23[%c0_91, %c0_92] : memref<6x64xbf16, #tpu.memory_space<vmem>>, vector<4x64xbf16>
    %c1_93 = arith.constant 1 : index
    %c0_94 = arith.constant 0 : index
    %84 = vector.load %arg23[%c1_93, %c0_94] : memref<6x64xbf16, #tpu.memory_space<vmem>>, vector<4x64xbf16>
    %c2_95 = arith.constant 2 : index
    %c0_96 = arith.constant 0 : index
    %85 = vector.load %arg23[%c2_95, %c0_96] : memref<6x64xbf16, #tpu.memory_space<vmem>>, vector<4x64xbf16>
    %86 = tpu.concatenate %83, %84, %85 in 1 : vector<4x64xbf16>, vector<4x64xbf16>, vector<4x64xbf16> -> vector<4x192xbf16>
    %c0_97 = arith.constant 0 : index
    %c0_98 = arith.constant 0 : index
    %87 = vector.load %arg10[%c0_97, %c0_98] : memref<192x128xbf16, #tpu.memory_space<vmem>>, vector<192x128xbf16>
    %cst_99 = arith.constant dense<0.000000e+00> : vector<4x128xf32>
    %88 = tpu.matmul %86, %87, %cst_99 {dimension_numbers = #tpu.dot_dimension_numbers<[1], [0], [0], [1], [0, 0, 1, 1], [], []>} : vector<4x192xbf16>, vector<192x128xbf16>, vector<4x128xf32> -> vector<4x128xf32>
    %c0_100 = arith.constant 0 : index
    %c0_101 = arith.constant 0 : index
    %89 = vector.load %arg11[%c0_100, %c0_101] : memref<1x128xf32, #tpu.memory_space<vmem>>, vector<1x128xf32>
    %90 = vector.broadcast %89 : vector<1x128xf32> to vector<4x128xf32>
    %91 = arith.addf %88, %90 : vector<4x128xf32>
    %cst_102 = arith.constant 0.000000e+00 : f32
    %92 = vector.broadcast %cst_102 : f32 to vector<4x128xf32>
    %93 = arith.maximumf %91, %92 : vector<4x128xf32>
    %94 = arith.truncf %93 : vector<4x128xf32> to vector<4x128xbf16>
    %cst_103 = arith.constant 0.000000e+00 : bf16
    %95 = vector.broadcast %cst_103 : bf16 to vector<1x128xbf16>
    %c0_104 = arith.constant 0 : index
    %c0_105 = arith.constant 0 : index
    %96 = vector.load %arg24[%c0_104, %c0_105] : memref<6x128xbf16, #tpu.memory_space<vmem>>, vector<1x128xbf16>
    tpu.vector_store %arg24[%c0_104, %c0_105], %95 {strides = array<i32>} : memref<6x128xbf16, #tpu.memory_space<vmem>>, vector<1x128xbf16>,
    %c1_106 = arith.constant 1 : index
    %c0_107 = arith.constant 0 : index
    %97 = vector.load %arg24[%c1_106, %c0_107] : memref<6x128xbf16, #tpu.memory_space<vmem>>, vector<4x128xbf16>
    tpu.vector_store %arg24[%c1_106, %c0_107], %94 {strides = array<i32>} : memref<6x128xbf16, #tpu.memory_space<vmem>>, vector<4x128xbf16>,
    %c5_108 = arith.constant 5 : index
    %c0_109 = arith.constant 0 : index
    %98 = vector.load %arg24[%c5_108, %c0_109] : memref<6x128xbf16, #tpu.memory_space<vmem>>, vector<1x128xbf16>
    tpu.vector_store %arg24[%c5_108, %c0_109], %95 {strides = array<i32>} : memref<6x128xbf16, #tpu.memory_space<vmem>>, vector<1x128xbf16>,
    %c0_110 = arith.constant 0 : index
    %c0_111 = arith.constant 0 : index
    %99 = vector.load %arg24[%c0_110, %c0_111] : memref<6x128xbf16, #tpu.memory_space<vmem>>, vector<4x128xbf16>
    %c1_112 = arith.constant 1 : index
    %c0_113 = arith.constant 0 : index
    %100 = vector.load %arg24[%c1_112, %c0_113] : memref<6x128xbf16, #tpu.memory_space<vmem>>, vector<4x128xbf16>
    %c2_114 = arith.constant 2 : index
    %c0_115 = arith.constant 0 : index
    %101 = vector.load %arg24[%c2_114, %c0_115] : memref<6x128xbf16, #tpu.memory_space<vmem>>, vector<4x128xbf16>
    %102 = tpu.concatenate %99, %100, %101 in 1 : vector<4x128xbf16>, vector<4x128xbf16>, vector<4x128xbf16> -> vector<4x384xbf16>
    %c0_116 = arith.constant 0 : index
    %c0_117 = arith.constant 0 : index
    %103 = vector.load %arg12[%c0_116, %c0_117] : memref<384x128xbf16, #tpu.memory_space<vmem>>, vector<384x128xbf16>
    %cst_118 = arith.constant dense<0.000000e+00> : vector<4x128xf32>
    %104 = tpu.matmul %102, %103, %cst_118 {dimension_numbers = #tpu.dot_dimension_numbers<[1], [0], [0], [1], [0, 0, 1, 1], [], []>} : vector<4x384xbf16>, vector<384x128xbf16>, vector<4x128xf32> -> vector<4x128xf32>
    %c0_119 = arith.constant 0 : index
    %c0_120 = arith.constant 0 : index
    %105 = vector.load %arg13[%c0_119, %c0_120] : memref<1x128xf32, #tpu.memory_space<vmem>>, vector<1x128xf32>
    %106 = vector.broadcast %105 : vector<1x128xf32> to vector<4x128xf32>
    %107 = arith.addf %104, %106 : vector<4x128xf32>
    %cst_121 = arith.constant 0.000000e+00 : f32
    %108 = vector.broadcast %cst_121 : f32 to vector<4x128xf32>
    %109 = arith.maximumf %107, %108 : vector<4x128xf32>
    %c0_122 = arith.constant 0 : index
    %c0_123 = arith.constant 0 : index
    %c0_124 = arith.constant 0 : index
    %110 = vector.load %arg18[%c0_122, %c0_123, %c0_124] : memref<1x4x128xf32, #tpu.memory_space<vmem>>, vector<1x4x128xf32>
    %111 = vector.shape_cast %110 : vector<1x4x128xf32> to vector<4x128xf32>
    %112 = vector.shape_cast %109 : vector<4x128xf32> to vector<1x4x128xf32>
    tpu.vector_store %arg18[%c0_122, %c0_123, %c0_124], %112 {strides = array<i32>} : memref<1x4x128xf32, #tpu.memory_space<vmem>>, vector<1x4x128xf32>,
    return
  }
  func.func @transform_0(%arg0: i32) -> (i32, i32, i32) {
    %c0_i32 = arith.constant 0 : i32
    %c0_i32_0 = arith.constant 0 : i32
    %c0_i32_1 = arith.constant 0 : i32
    return %arg0, %c0_i32, %c0_i32_0 : i32, i32, i32
  }
  func.func @transform_1(%arg0: i32) -> (i32, i32) {
    %c0_i32 = arith.constant 0 : i32
    %c0_i32_0 = arith.constant 0 : i32
    %c0_i32_1 = arith.constant 0 : i32
    return %c0_i32, %c0_i32_0 : i32, i32
  }
  func.func @transform_2(%arg0: i32) -> (i32, i32) {
    %c0_i32 = arith.constant 0 : i32
    %c0_i32_0 = arith.constant 0 : i32
    %c0_i32_1 = arith.constant 0 : i32
    return %c0_i32, %c0_i32_0 : i32, i32
  }
  func.func @transform_3(%arg0: i32) -> (i32, i32) {
    %c0_i32 = arith.constant 0 : i32
    %c0_i32_0 = arith.constant 0 : i32
    %c0_i32_1 = arith.constant 0 : i32
    return %c0_i32, %c0_i32_0 : i32, i32
  }
  func.func @transform_4(%arg0: i32) -> (i32, i32) {
    %c0_i32 = arith.constant 0 : i32
    %c0_i32_0 = arith.constant 0 : i32
    %c0_i32_1 = arith.constant 0 : i32
    return %c0_i32, %c0_i32_0 : i32, i32
  }
  func.func @transform_5(%arg0: i32) -> (i32, i32) {
    %c0_i32 = arith.constant 0 : i32
    %c0_i32_0 = arith.constant 0 : i32
    %c0_i32_1 = arith.constant 0 : i32
    return %c0_i32, %c0_i32_0 : i32, i32
  }
  func.func @transform_6(%arg0: i32) -> (i32, i32) {
    %c0_i32 = arith.constant 0 : i32
    %c0_i32_0 = arith.constant 0 : i32
    %c0_i32_1 = arith.constant 0 : i32
    return %c0_i32, %c0_i32_0 : i32, i32
  }
  func.func @transform_7(%arg0: i32) -> (i32, i32) {
    %c0_i32 = arith.constant 0 : i32
    %c0_i32_0 = arith.constant 0 : i32
    %c0_i32_1 = arith.constant 0 : i32
    return %c0_i32, %c0_i32_0 : i32, i32
  }
  func.func @transform_8(%arg0: i32) -> (i32, i32) {
    %c0_i32 = arith.constant 0 : i32
    %c0_i32_0 = arith.constant 0 : i32
    %c0_i32_1 = arith.constant 0 : i32
    return %c0_i32, %c0_i32_0 : i32, i32
  }
  func.func @transform_9(%arg0: i32) -> (i32, i32) {
    %c0_i32 = arith.constant 0 : i32
    %c0_i32_0 = arith.constant 0 : i32
    %c0_i32_1 = arith.constant 0 : i32
    return %c0_i32, %c0_i32_0 : i32, i32
  }
  func.func @transform_10(%arg0: i32) -> (i32, i32) {
    %c0_i32 = arith.constant 0 : i32
    %c0_i32_0 = arith.constant 0 : i32
    %c0_i32_1 = arith.constant 0 : i32
    return %c0_i32, %c0_i32_0 : i32, i32
  }
  func.func @transform_11(%arg0: i32) -> (i32, i32) {
    %c0_i32 = arith.constant 0 : i32
    %c0_i32_0 = arith.constant 0 : i32
    %c0_i32_1 = arith.constant 0 : i32
    return %c0_i32, %c0_i32_0 : i32, i32
  }
  func.func @transform_12(%arg0: i32) -> (i32, i32) {
    %c0_i32 = arith.constant 0 : i32
    %c0_i32_0 = arith.constant 0 : i32
    %c0_i32_1 = arith.constant 0 : i32
    return %c0_i32, %c0_i32_0 : i32, i32
  }
  func.func @transform_13(%arg0: i32) -> (i32, i32) {
    %c0_i32 = arith.constant 0 : i32
    %c0_i32_0 = arith.constant 0 : i32
    %c0_i32_1 = arith.constant 0 : i32
    return %c0_i32, %c0_i32_0 : i32, i32
  }
  func.func @transform_14(%arg0: i32) -> (i32, i32) {
    %c0_i32 = arith.constant 0 : i32
    %c0_i32_0 = arith.constant 0 : i32
    %c0_i32_1 = arith.constant 0 : i32
    return %c0_i32, %c0_i32_0 : i32, i32
  }
  func.func @transform_15(%arg0: i32) -> (i32, i32) {
    %c0_i32 = arith.constant 0 : i32
    %c0_i32_0 = arith.constant 0 : i32
    %c0_i32_1 = arith.constant 0 : i32
    return %c0_i32, %c0_i32_0 : i32, i32
  }
  func.func @transform_16(%arg0: i32) -> (i32, i32) {
    %c0_i32 = arith.constant 0 : i32
    %c0_i32_0 = arith.constant 0 : i32
    %c0_i32_1 = arith.constant 0 : i32
    return %c0_i32, %c0_i32_0 : i32, i32
  }
  func.func @transform_17(%arg0: i32) -> (i32, i32, i32) {
    %c0_i32 = arith.constant 0 : i32
    %c0_i32_0 = arith.constant 0 : i32
    %c0_i32_1 = arith.constant 0 : i32
    return %arg0, %c0_i32, %c0_i32_0 : i32, i32, i32
  }
}

</mosaic_0001>

<bundles_post_ra>
// kernel: tpu_custom_call.1
= control target key start
LH: loop header
LB: loop body
LE: loop exit
PB: predicated region body
PF: predicated region fallthrough
CT: control target
= control target key end

     0   :  { %s4390_s0 = inlined_call_operand.hbm [shape: f32[2,16,64], index: 0, kind: input, shape index: {}]   ;;  %s4391_s1 = inlined_call_operand.hbm [shape: bf16[192,128], index: 1, kind: input, shape index: {}]   ;;  %s4392_s2 = inlined_call_operand.vmem [shape: f32[1,128], index: 2, kind: input, shape index: {}]   ;;  %s4393_s3 = inlined_call_operand.vmem [shape: bf16[384,128], index: 3, kind: input, shape index: {}]   ;;  %s4394_s4 = inlined_call_operand.vmem [shape: f32[1,128], index: 4, kind: input, shape index: {}]   ;;  %s4395_s5 = inlined_call_operand.hbm [shape: bf16[192,128], index: 5, kind: input, shape index: {}]   ;;  %s4396_s6 = inlined_call_operand.vmem [shape: f32[1,128], index: 6, kind: input, shape index: {}]   ;;  %s4397_s7 = inlined_call_operand.hbm [shape: bf16[384,128], index: 7, kind: input, shape index: {}]   ;;  %s4398_s8 = inlined_call_operand.vmem [shape: f32[1,128], index: 8, kind: input, shape index: {}]   ;;  %s4399_s9 = inlined_call_operand.hbm [shape: bf16[192,128], index: 9, kind: input, shape index: {}]   ;;  %s4400_s10 = inlined_call_operand.vmem [shape: f32[1,128], index: 10, kind: input, shape index: {}]   ;;  %s4401_s11 = inlined_call_operand.hbm [shape: bf16[384,128], index: 11, kind: input, shape index: {}]   ;;  %s4402_s12 = inlined_call_operand.vmem [shape: f32[1,128], index: 12, kind: input, shape index: {}]   ;;  %s4403_s13 = inlined_call_operand.vmem [shape: bf16[8,16], index: 13, kind: input, shape index: {}]   ;;  %s4404_s14 = inlined_call_operand.vmem [shape: bf16[128,64], index: 14, kind: input, shape index: {}]   ;;  %s4405_s15 = inlined_call_operand.vmem [shape: bf16[4,8], index: 15, kind: input, shape index: {}]   ;;  %s4406_s16 = inlined_call_operand.vmem [shape: bf16[128,64], index: 16, kind: input, shape index: {}]   ;;  %s4407_s17 = inlined_call_operand.hbm [shape: f32[2,4,128], index: 17, kind: output, shape index: {}]  }
   0x1   :  { %4415 = sst [smem:[#allocation25_spill]] %s4390_s0 }
   0x2   :  { %4416 = sst [smem:[#allocation26_spill]] %s4391_s1 }
   0x3   :  { %4417 = sst [smem:[#allocation27_spill]] %s4396_s6 }
   0x4   :  { %4418 = sst [smem:[#allocation28_spill]] %s4397_s7 }
   0x5   :  { %4419 = sst [smem:[#allocation29_spill]] %s4398_s8 }
   0x6   :  { %4420 = sst [smem:[#allocation30_spill]] %s4400_s10 }
   0x7   :  { %4421 = sst [smem:[#allocation31_spill]] %s4402_s12 }
   0x8   :  { %4422 = sst [smem:[#allocation32_spill]] %s4403_s13 }
   0x9   :  { %4423 = sst [smem:[#allocation33_spill]] %s4405_s15 }
   0xa   :  { %4424 = sst [smem:[#allocation34_spill]] %s4406_s16 }
   0xb   :  { %4425 = sst [smem:[#allocation35_spill]] %s4407_s17 }
   0xc   :  { %22 = vsyncpa [#allocation9], 0 }
   0xd   :  { %24 = vsyncpa [#allocation9 + $0x1], 0 }
   0xe   :  { %25 = vsyncpa [#allocation12], 0 }
   0xf   :  { %26 = vsyncpa [#allocation15], 0 }
  0x10   :  { %27 = vsyncpa [#allocation18], 0 }
  0x11   :  { %28 = vsyncpa [#allocation10], 0 }
  0x12   :  { %30 = vsyncpa [#allocation10 + $0x1], 0  ;;  %s3739_s24 = smov 0   ;;  %s3741_s25 = smov 0  }
  0x13   :  { %s3743_s26 = smov 0   ;;  %s3745_s27 = smov 0  }
  0x14 LB: > { %s3634_s28 = smov [#allocation11]   ;;  %s3760_s0 = sadd.s32 4294967295, %s3632_s27   ;;  %s3632_s27 = sphi %s3745_s27, %s4472_s27   ;;  %s3628_s26 = sphi %s3743_s26, %s4471_s26   ;;  %s3624_s25 = sphi %s3741_s25, %s4470_s25   ;;  %s3620_s24 = sphi %s3739_s24, %s4469_s24  }
  0x15   : > { %s441_s29 = sshll.u32 %s3634_s28, 4  ;;  %p2726_p0 = scmp.ge.s32.totalorder %s3632_s27, 1  ;;  %s3765_s29 = int_to_ptr.vmem [resolvable:$true] %s441_s29 }
  0x16   : > { %p4412_p1 = scmp.eq.s32.totalorder %s3760_s0, 0  ;;  %p429_p2 = scmp.lt.s32.totalorder %s3632_s27, 3 }
  0x17   : > { %s3635_s18 = smov [#allocation14]   ;;  %s3636_s20 = smov [#allocation13]  }
  0x18   : > { %p3767_p3 = pnand %p2726_p0, %p429_p2  ;;  %s479_s19 = sshll.u32 %s3635_s18, 4  ;;  %s3780_s19 = int_to_ptr.vmem [resolvable:$true] %s479_s19 }
  0x19   : > { %s463_s21 = sshll.u32 %s3636_s20, 4  ;;  %s4428_s28 = sld [smem:[#allocation26_spill]]  ;;  %s3782_s21 = int_to_ptr.vmem [resolvable:$true] %s463_s21 }
  0x1a   : > { %s4426_s30 = scalar_select %p3767_p3, 1, 0 }
  0x1b   : > { %p3165_p5 = pneg %p3767_p3 }
  0x1d   : > { %p3776_p6 = pnand %p3165_p5, %p4412_p1 }
  0x1f   : > { %s3384_s17 = scalar_lea.hbm %s4428_s28, 1536  ;;  %p3792_p8 = pneg %p3776_p6 }
  0x20   : > { %p3385_p7 = scmp.ne.s32.totalorder %s4428_s28, %s3384_s17  ;;  %p3391_p11 = scmp.lt.u32.totalorder %s3384_s17, %s4428_s28 }
  0x22   : > { %p3387_p9 = pnand %p3792_p8, %p3385_p7 }
  0x24   : > { %p3388_p10 = pneg %p3387_p9 }
  0x26   : > { %p3393_p12 = pnand %p3391_p11, %p3388_p10 }
  0x28   : > { %3396 = shalt.err (!%p3393_p12)
}
  0x29   : > { %s3397_s10 = scalar_lea.vmem %s3765_s29, 1536  ;;  %p3405_p5 = scmp.lt.s32.totalorder %s3765_s29, %s3765_s29 }
  0x2a   : > { %p3398_p13 = scmp.ne.s32.totalorder %s3765_s29, %s3397_s10  ;;  %p3406_p4 = scmp.lt.s32.totalorder %s3397_s10, %s3397_s10 }
  0x2c   : > { %p3400_p0 = pnand %p3398_p13, %p3792_p8  ;;  %p3407_p7 = por %p3406_p4, %p3405_p5 }
  0x2e   : > { %p3401_p2 = pneg %p3400_p0 }
  0x30   : > { %p3408_p9 = pnand %p3407_p7, %p3401_p2 }
  0x32   : > { %3411 = shalt.err (!%p3408_p9)
}
  0x33   : > { %s3637_s12 = smov 64   ;;  %s3638_s15 = smov 4  }
  0x34   : > { %3168 = dma.hbm_to_vmem [thread:$0]  (!%p3776_p6), %s4428_s28, 1536, %s3765_s29, [#allocation12], %s3637_s12, %s3637_s12, %s3638_s15  }
  0x35   : > { %s4430_s7 = sld [smem:[#allocation28_spill]] }
  0x3b   : > { %s3412_s10 = scalar_lea.hbm %s4430_s7, 3072 }
  0x3c   : > { %p3413_p4 = scmp.ne.s32.totalorder %s4430_s7, %s3412_s10  ;;  %p3419_p12 = scmp.lt.u32.totalorder %s3412_s10, %s4430_s7 }
  0x3e   : > { %p3415_p10 = pnand %p3413_p4, %p3792_p8 }
  0x40   : > { %p3416_p11 = pneg %p3415_p10 }
  0x42   : > { %p3421_p13 = pnand %p3419_p12, %p3416_p11 }
  0x44   : > { %3424 = shalt.err (!%p3421_p13)
}
  0x45   : > { %s3425_s29 = scalar_lea.vmem %s3780_s19, 3072  ;;  %p3433_p7 = scmp.lt.s32.totalorder %s3780_s19, %s3780_s19 }
  0x46   : > { %p3426_p0 = scmp.ne.s32.totalorder %s3780_s19, %s3425_s29  ;;  %p3434_p9 = scmp.lt.s32.totalorder %s3425_s29, %s3425_s29 }
  0x48   : > { %p3428_p2 = pnand %p3426_p0, %p3792_p8  ;;  %p3435_p4 = por %p3434_p9, %p3433_p7 }
  0x4a   : > { %p3429_p5 = pneg %p3428_p2 }
  0x4c   : > { %p3436_p10 = pnand %p3435_p4, %p3429_p5 }
  0x4e   : > { %3439 = shalt.err (!%p3436_p10)
}
  0x4f   : > { %3174 = dma.hbm_to_vmem [thread:$0]  (!%p3776_p6), %s4430_s7, 3072, %s3780_s19, [#allocation15], %s3637_s12, %s3637_s12, %s3638_s15  }
  0x50   : > { %s3440_s17 = scalar_lea.hbm %s4395_s5, 1536 }
  0x51   : > { %p3441_p11 = scmp.ne.s32.totalorder %s4395_s5, %s3440_s17  ;;  %p3447_p0 = scmp.lt.u32.totalorder %s3440_s17, %s4395_s5 }
  0x53   : > { %p3443_p12 = pnand %p3441_p11, %p3792_p8 }
  0x55   : > { %p3444_p13 = pneg %p3443_p12 }
  0x57   : > { %p3449_p2 = pnand %p3447_p0, %p3444_p13 }
  0x59   : > { %3452 = shalt.err (!%p3449_p2)
}
  0x5a   : > { %s3453_s19 = scalar_lea.vmem %s3782_s21, 1536  ;;  %p3461_p4 = scmp.lt.s32.totalorder %s3782_s21, %s3782_s21 }
  0x5b   : > { %p3454_p5 = scmp.ne.s32.totalorder %s3782_s21, %s3453_s19  ;;  %p3462_p10 = scmp.lt.s32.totalorder %s3453_s19, %s3453_s19 }
  0x5d   : > { %p3456_p7 = pnand %p3454_p5, %p3792_p8  ;;  %p3463_p11 = por %p3462_p10, %p3461_p4 }
  0x5f   : > { %p3457_p9 = pneg %p3456_p7 }
  0x61   : > { %p3464_p12 = pnand %p3463_p11, %p3457_p9 }
  0x63   : > { %3467 = shalt.err (!%p3464_p12)
}
  0x64   : > { %3171 = dma.hbm_to_vmem [thread:$0]  (!%p3776_p6), %s4395_s5, 1536, %s3782_s21, [#allocation12], %s3637_s12, %s3637_s12, %s3638_s15  }
  0x65   : > { %s3639_s8 = smov [#allocation16]   ;;  %s3640_s16 = smov [#allocation17]  }
  0x66   : > { %s495_s13 = sshll.u32 %s3639_s8, 4  ;;  %s511_s17 = sshll.u32 %s3640_s16, 4  ;;  %s496_s13 = int_to_ptr.vmem [resolvable:$true] %s495_s13  ;;  %s512_s17 = int_to_ptr.vmem [resolvable:$true] %s511_s17 }
  0x67   : > { %s3468_s20 = scalar_lea.hbm %s4399_s9, 1536 }
  0x68   : > { %p3469_p13 = scmp.ne.s32.totalorder %s4399_s9, %s3468_s20  ;;  %p3475_p5 = scmp.lt.u32.totalorder %s3468_s20, %s4399_s9 }
  0x6a   : > { %p3471_p0 = pnand %p3469_p13, %p3792_p8 }
  0x6c   : > { %p3472_p2 = pneg %p3471_p0 }
  0x6e   : > { %p3477_p7 = pnand %p3475_p5, %p3472_p2 }
  0x70   : > { %3480 = shalt.err (!%p3477_p7)
}
  0x71   : > { %s3481_s21 = scalar_lea.vmem %s496_s13, 1536  ;;  %p3489_p11 = scmp.lt.s32.totalorder %s496_s13, %s496_s13 }
  0x72   : > { %p3482_p9 = scmp.ne.s32.totalorder %s496_s13, %s3481_s21  ;;  %p3490_p12 = scmp.lt.s32.totalorder %s3481_s21, %s3481_s21 }
  0x74   : > { %p3484_p4 = pnand %p3482_p9, %p3792_p8  ;;  %p3491_p1 = por %p3490_p12, %p3489_p11 }
  0x76   : > { %p3485_p10 = pneg %p3484_p4 }
  0x78   : > { %p3492_p3 = pnand %p3491_p1, %p3485_p10 }
  0x7a   : > { %3495 = shalt.err (!%p3492_p3)
}
  0x7b   : > { %3177 = dma.hbm_to_vmem [thread:$0]  (!%p3776_p6), %s4399_s9, 1536, %s496_s13, [#allocation15], %s3637_s12, %s3637_s12, %s3638_s15  }
  0x7c   : > { %s3496_s22 = scalar_lea.hbm %s4401_s11, 3072 }
  0x7d   : > { %p3497_p1 = scmp.ne.s32.totalorder %s4401_s11, %s3496_s22  ;;  %p3503_p0 = scmp.lt.u32.totalorder %s3496_s22, %s4401_s11 }
  0x7f   : > { %p3499_p3 = pnand %p3497_p1, %p3792_p8 }
  0x81   : > { %p3500_p13 = pneg %p3499_p3 }
  0x83   : > { %p3505_p2 = pnand %p3503_p0, %p3500_p13 }
  0x85   : > { %3508 = shalt.err (!%p3505_p2)
}
  0x86   : > { %s3509_s29 = scalar_lea.vmem %s512_s17, 3072  ;;  %p3517_p4 = scmp.lt.s32.totalorder %s512_s17, %s512_s17 }
  0x87   : > { %p3510_p5 = scmp.ne.s32.totalorder %s512_s17, %s3509_s29  ;;  %p3518_p10 = scmp.lt.s32.totalorder %s3509_s29, %s3509_s29 }
  0x89   : > { %p3512_p7 = pnand %p3510_p5, %p3792_p8  ;;  %p3519_p11 = por %p3518_p10, %p3517_p4 }
  0x8b   : > { %p3513_p9 = pneg %p3512_p7 }
  0x8d   : > { %p3520_p12 = pnand %p3519_p11, %p3513_p9 }
  0x8f   : > { %3523 = shalt.err (!%p3520_p12)
}
  0x90   : > { %3180 = dma.hbm_to_vmem [thread:$0]  (!%p3776_p6), %s4401_s11, 3072, %s512_s17, [#allocation18], %s3637_s12, %s3637_s12, %s3638_s15  }
  0x91   : > { %s2725_s1 = sadd.s32 4294967294, %s3632_s27   ;;  %s3912_s18 = sadd.s32 1, %s3632_s27  }
  0x92   : > { %s43_s7 = sadd.s32 1, %s3628_s26  ;;  %s40_s6 = ssub.s32 %s3632_s27, %s3912_s18 }
  0x93   : > { %p50_p8 = scmp.ne.s32.totalorder %s3628_s26, %s3624_s25  ;;  %p41_p1 = scmp.eq.s32.totalorder %s40_s6, 0 }
  0x94   : > { %p51_p3 = scmp.eq.s32.totalorder %s3632_s27, 0  ;;  %p56_p13 = scmp.ne.s32.totalorder %s3624_s25, %s3620_s24 }
  0x95   : > { %p416_p0 = scmp.eq.s32.totalorder %s3760_s0, 1  ;;  %p4431_p5 = scmp.eq.s32.totalorder %s3760_s0, 0 }
  0x96   : > { %s3924_s8 = scalar_select %p41_p1, %s3628_s26, %s43_s7  }
  0x97   : > { %p52_p2 = por %p51_p3, %p50_p8  ;;  %p3928_p7 = por %p4431_p5, %p56_p13 }
  0x98   : > { %p3932_p6 = por %p416_p0, %p50_p8  ;;  %p422_p9 = scmp.eq.s32.totalorder %s2725_s1, 1 }
  0x99   : > { %p3194_p4 = scmp.lt.s32.totalorder %s3632_s27, 2  ;;  %s540_s15 = sand.u32 1, %s3628_s26  }
  0x9a   : > { %s4433_s12 = scalar_select %p3932_p6, 1, 0 }
  0x9b   : > { %p3938_p10 = por %p422_p9, %p56_p13  ;;  %s2733_s22 = sshll.u32 %s540_s15, 4 }
  0x9c   : > { %s2905_s23 = sshll.u32 %s3632_s27, 8  ;;  %s4435_s19 = sld [smem:[#allocation25_spill]] }
  0x9d   : > { %s4434_s17 = scalar_select %p3938_p10, 1, 0 }
  0x9e   : > { %s544_s13 = scalar_lea.vmem [#allocation8], %s2733_s22  ;;  %p3948_p11 = pnand %p3194_p4, %p52_p2 }
  0x9f   : > { %s551_s21 = sshll.u32 %s544_s13, 4  ;;  %s3954_s7 = scalar_lea.sflag [#allocation9], %s540_s15  ;;  %s3952_s21 = int_to_ptr.vmem [resolvable:$true] %s551_s21 }
  0xa0   : > { %p3526_p8 = pneg %p3948_p11 }
  0xa2   : > { %s3946_s29 = scalar_lea.hbm %s4435_s19, %s2905_s23  ;;  %s3529_s20 = scalar_lea.hbm %s4435_s19, 512 }
  0xa3   : > { %s3524_s6 = scalar_lea.hbm %s3946_s29, 256  ;;  %p3530_p13 = scmp.lt.u32.totalorder %s3946_s29, %s4435_s19 }
  0xa4   : > { %p3525_p12 = scmp.ne.s32.totalorder %s3946_s29, %s3524_s6  ;;  %p3531_p0 = scmp.lt.u32.totalorder %s3529_s20, %s3524_s6 }
  0xa5   : > { %p3533_p5 = scmp.lt.u32.totalorder %s3524_s6, %s3946_s29 }
  0xa6   : > { %p3527_p1 = pnand %p3526_p8, %p3525_p12  ;;  %p3532_p2 = por %p3531_p0, %p3530_p13 }
  0xa8   : > { %p3528_p3 = pneg %p3527_p1  ;;  %p3534_p9 = por %p3533_p5, %p3532_p2 }
  0xaa   : > { %p3535_p4 = pnand %p3534_p9, %p3528_p3 }
  0xac   : > { %3538 = shalt.err (!%p3535_p4)
}
  0xad   : > { %s3539_s15 = scalar_lea.vmem %s3952_s21, 256  ;;  %s3641_s22 = smov [#allocation8]  }
  0xae   : > { %p3540_p12 = scmp.ne.s32.totalorder %s3952_s21, %s3539_s15  ;;  %s3544_s23 = sshll.u32 %s3641_s22, 4  ;;  %s3545_s23 = int_to_ptr.vmem [resolvable:$false] %s3544_s23 }
  0xaf   : > { %s3546_s10 = scalar_lea.vmem %s3545_s23, 512  ;;  %p3547_p6 = scmp.lt.s32.totalorder %s3952_s21, %s3545_s23 }
  0xb0   : > { %p3542_p1 = pnand %p3540_p12, %p3526_p8  ;;  %p3548_p13 = scmp.lt.s32.totalorder %s3546_s10, %s3539_s15 }
  0xb2   : > { %p3543_p10 = pneg %p3542_p1  ;;  %p3549_p0 = por %p3548_p13, %p3547_p6 }
  0xb4   : > { %p3550_p2 = pnand %p3549_p0, %p3543_p10 }
  0xb6   : > { %3553 = shalt.err (!%p3550_p2)
}
  0xb7   : > { %s3642_s6 = smov 128   ;;  %s3643_s20 = smov 8  }
  0xb8   : > { %3184 = dma.hbm_to_vmem [thread:$0]  (!%p3948_p11), %s3946_s29, 256, %s3952_s21, %s3954_s7, %s3642_s6, %s3642_s6, %s3643_s20  }
  0xb9   : > { %p4437_p8 = scmp.ne.s32.totalorder %s4426_s30, 0 }
  0xba   : > { %s3985_s13 = sand.u32 (!%p4437_p8), 1, %s3624_s25  }
  0xbb   : > { %563 = sbr.rel (%p4437_p8) target bundleno = 3010 (0xbc2), region = 88  ;;  %s2737_s15 = sshll.u32 (!%p4437_p8), %s3985_s13, 4 }
  0xbc   : > { %s566_s22 = scalar_lea.sflag (!%p4437_p8), [#allocation9], %s3985_s13  ;;  %s569_s23 = scalar_lea.vmem (!%p4437_p8), [#allocation8], %s2737_s15 }
  0xc2   : > { %3599 = dma.done.wait (%p3928_p7), %s566_s22, 256  }
  0xc3   : > { %3601 = vsyncadd (%p3928_p7), %s566_s22, 4294967040  ;;  %p4438_p6 = scmp.eq.s32.totalorder %s3760_s0, 0 }
  0xc5   : > { %3603 = dma.done.wait (%p4438_p6), [#allocation12], 3072   ;;  %p4439_p10 = pmov %p4438_p6 }
  0xc6   : > { %p4440_p11 = pmov %p4438_p6 }
  0xc7   : > { %3605 = vsyncadd (%p4439_p10), [#allocation12], 4294964224 }
  0xc8   : > { %3607 = dma.done.wait (%p4440_p11), [#allocation15], 4608   ;;  %p4441_p3 = pmov %p4438_p6 }
  0xca   : > { %3609 = vsyncadd (%p4441_p3), [#allocation15], 4294962688  ;;  %p4442_p5 = pmov %p4441_p3 }
  0xcb   : > { %p4443_p9 = pmov %p4441_p3 }
  0xcc   : > { %3611 = dma.done.wait (%p4442_p5), [#allocation18], 3072  }
  0xcd   : > { %3613 = vsyncadd (%p4443_p9), [#allocation18], 4294964224  ;;  %vm644_vm0 = vcmask 516096   ;;  %vm645_vm1 = vsmask.f32 256  ;;  %v3644_v0 = vmov 0  }
  0xce   : > { %836 = vmatprep.subr.bf16.mxu0 %v3644_v0  ;;  %vm4008_vm2 = vmand %vm644_vm0, %vm645_vm1  ;;  %vm677_vm3 = vcmask 519168   ;;  %v641_v2 = vld [vmem:[%s569_s23] sm:$0xff]  ;;  %v642_v3 = vld [vmem:[%s569_s23 + $0x8] sm:$0xff]  ;;  %vm655_vm4 = vsmask.f32 4368  ;;  %vm722_vm10 = vcmask 1046528  }
  0xcf   : > { %v647_v4 = vld [vmem:[#allocation2] sm:$0x1]  ;;  %v2906_v6 = vpack.c.bf16 %v641_v2, %v641_v2  ;;  %v2907_v7 = vpack.c.bf16 %v642_v3, %v642_v3  ;;  %vm678_vm5 = vsmask.f32 7938  ;;  %v3248_v8 = vld [vmem:[#allocation11] sm:$0xff]   ;;  %v3249_v13 = vld [vmem:[#allocation11 + $0x8] sm:$0xff]  }
  0xd0   : > { %v648_v5 = vsel %vm4008_vm2, 0, %v647_v4  ;;  %837 = vmatpush1.bf16.msra.mxu0 %v3248_v8  ;;  %vm4016_vm6 = vmor %vm645_vm1, %vm655_vm4  ;;  %v685_v17 = vld [vmem:[#allocation2 + $0x8] sm:$0x1]  ;;  %v3250_v23 = vld [vmem:[#allocation11 + $0x10] sm:$0xff]   ;;  %vm704_vm9 = vsmask.f32 7424 }
  0xd1   : > { %649 = vst [vmem:[#allocation2] sm:$0x1] %v648_v5  ;;  %v658_v9 = vshrl.u32 %v2906_v6, 16  ;;  %v661_v10 = vshll.u32 %v2906_v6, 16  ;;  %v666_v11 = vshrl.u32 %v2907_v7, 16  ;;  %v669_v12 = vshll.u32 %v2907_v7, 16  ;;  %838 = vmatprep.subr.bf16.mxu0 %v3644_v0  ;;  %vm4022_vm7 = vmand %vm677_vm3, %vm678_vm5 }
  0xd2   : > { %v3251_v28 = vld [vmem:[#allocation11 + $0x18] sm:$0xff]   ;;  %vm4036_vm8 = vmand %vm644_vm0, %vm678_vm5  ;;  %v3252_v30 = vld [vmem:[#allocation11 + $0x20] sm:$0xff]   ;;  %vm726_vm11 = vcmask 523264   ;;  %s3645_s30 = smov 64   ;;  %vm880_vm12 = vcmask 1040384   ;;  %vm3647_vm14 = vmmov 0  }
  0xd3   : > { %v660_v15 = vrot.slane %v658_v9, 7  ;;  %v668_v16 = vrot.slane %v666_v11, 7  ;;  %v3253_v35 = vld [vmem:[#allocation11 + $0x28] sm:$0xff]   ;;  %v3254_v39 = vld [vmem:[#allocation11 + $0x30] sm:$0xff]   ;;  %v3255_v43 = vld [vmem:[#allocation11 + $0x38] sm:$0xff]   ;;  %vm910_vm15 = vcmask 1043456  }
  0xd4   : > { %839 = vmatpush1.bf16.msra.mxu0 %v3249_v13  ;;  %v3256_v50 = vld [vmem:[#allocation11 + $0x40] sm:$0xff]   ;;  %v3257_v53 = vld [vmem:[#allocation11 + $0x48] sm:$0xff]   ;;  %v3258_v54 = vld [vmem:[#allocation11 + $0x50] sm:$0xff]   ;;  %s4458_s7 = sld [smem:[#allocation32_spill]]  ;;  %s4459_s20 = sld [smem:[#allocation27_spill]]  ;;  %vm2023_vm4 = vcmask 64512  }
  0xd5   : > { %v663_v18 = vor.u32 %v661_v10, %v660_v15  ;;  %v664_v19 = vrot.slane %v660_v15, 4  ;;  %v671_v20 = vor.u32 %v669_v12, %v668_v16  ;;  %v673_v21 = vrot.slane %v668_v16, 4  ;;  %840 = vmatprep.subr.bf16.mxu0 %v3644_v0  ;;  %v3259_v55 = vld [vmem:[#allocation11 + $0x58] sm:$0xff]   ;;  %vm4058_vm13 = vmand %vm880_vm12, %vm645_vm1  ;;  %v3261_v61 = vld [vmem:[%s4393_s3 + $0x40] sm:$0xff]   ;;  %s4460_s23 = sld [smem:[#allocation34_spill]]  ;;  %s4461_s6 = sld [smem:[#allocation29_spill]] }
  0xd6   : > { %v882_v59 = vld [vmem:[#allocation3] sm:$0x1]  ;;  %v3262_v62 = vld [vmem:[%s4393_s3] sm:$0xff]   ;;  %2914 = vmatprep.subr.bf16.mxu1 %v3261_v61  ;;  %v3265_v3 = vld [vmem:[%s4393_s3 + $0x50] sm:$0xff]   ;;  %v3646_v16 = vmov 0.0   ;;  %s4462_s22 = sld [smem:[#allocation33_spill]] }
  0xd7   : > { %v672_v24 = vsel %vm4016_vm6, %v664_v19, %v671_v20  ;;  %v686_v26 = vsel %vm4008_vm2, %v673_v21, %v685_v17  ;;  %v883_v60 = vsel %vm4058_vm13, 0, %v882_v59  ;;  %2915 = vmatpush3.bf16.msra.mxu1 %v3262_v62  ;;  %v3263_v63 = vld [vmem:[%s4393_s3 + $0x48] sm:$0xff]   ;;  %v3266_v4 = vld [vmem:[%s4393_s3 + $0x10] sm:$0xff]   ;;  %v3267_v5 = vld [vmem:[%s4393_s3 + $0x58] sm:$0xff]   ;;  %s4463_s29 = sld [smem:[#allocation30_spill]]  ;;  %s2743_s21 = sshll.u32 %s3985_s13, 2 }
  0xd8   : > { %v680_v25 = vld [vmem:[#allocation2] sm:$0xf]  ;;  %684 = vst.msk [vmem:[#allocation2 + $0x4] sm:$0xf] %vm677_vm3, %v672_v24  ;;  %687 = vst [vmem:[#allocation2 + $0x8] sm:$0x1] %v686_v26  ;;  %841 = vmatpush1.bf16.msra.mxu0 %v3250_v23  ;;  %2916 = vmatprep.subr.bf16.mxu1 %v3263_v63 }
  0xd9   : > { %v681_v27 = vsel %vm4022_vm7, %v663_v18, %v680_v25  ;;  %842 = vmatprep.subr.bf16.mxu0 %v3644_v0  ;;  %884 = vst [vmem:[#allocation3] sm:$0x1] %v883_v60  ;;  %v3264_v2 = vld [vmem:[%s4393_s3 + $0x8] sm:$0xff]   ;;  %v3268_v6 = vld [vmem:[%s4393_s3 + $0x18] sm:$0xff]   ;;  %v3269_v7 = vld [vmem:[%s4393_s3 + $0x60] sm:$0xff]   ;;  %vm1347_vm3 = vcmask 130048  }
  0xda   : > { %682 = vst [vmem:[#allocation2] sm:$0xf] %v681_v27  ;;  %v3270_v8 = vld [vmem:[%s4393_s3 + $0x20] sm:$0xff]   ;;  %v3271_v9 = vld [vmem:[%s4393_s3 + $0x68] sm:$0xff]   ;;  %v3273_v11 = vld [vmem:[%s4393_s3 + $0x70] sm:$0xff]   ;;  %s4464_s10 = sld [smem:[#allocation31_spill]] }
  0xdb   : > { %2917 = vmatpush3.bf16.msra.mxu1 %v3264_v2  ;;  %v3272_v10 = vld [vmem:[%s4393_s3 + $0x28] sm:$0xff]   ;;  %v3274_v12 = vld [vmem:[%s4393_s3 + $0x30] sm:$0xff]   ;;  %v3275_v13 = vld [vmem:[%s4393_s3 + $0x78] sm:$0xff]   ;;  %s4465_s16 = sld [smem:[#allocation35_spill]]  ;;  %s2594_s1 = scalar_lea.sflag [#allocation10], %s3985_s13 }
  0xdc   : > { %843 = vmatpush1.bf16.msra.mxu0 %v3251_v28  ;;  %2918 = vmatprep.subr.bf16.mxu1 %v3265_v3  ;;  %v3276_v15 = vld [vmem:[%s4393_s3 + $0x38] sm:$0xff]   ;;  %v2749_v17 = vld [vmem:[%s4392_s2] ss:$0 sm:$0xff]  ;;  %vm4121_vm0 = vmand %vm910_vm15, %vm678_vm5  ;;  %p4466_p4 = scmp.ne.s32.totalorder %s4433_s12, 0 }
  0xdd   : > { %844 = vmatprep.subr.bf16.mxu0 %v3644_v0  ;;  %vm4133_vm1 = vmand %vm880_vm12, %vm678_vm5  ;;  %v3279_v59 = vld [vmem:[%s4393_s3 + $0x80] sm:$0xff]   ;;  %v3280_v61 = vld [vmem:[%s4393_s3 + $0x88] sm:$0xff]   ;;  %vm2087_vm5 = vsmask.f32 2306  ;;  %vm2288_vm12 = vcmask 1042434  }
  0xde   : > { %v3281_v62 = vld [vmem:[%s4393_s3 + $0x90] sm:$0xff]   ;;  %v3282_v63 = vld [vmem:[%s4393_s3 + $0x98] sm:$0xff]   ;;  %v3283_v2 = vld [vmem:[%s4393_s3 + $0xa0] sm:$0xff]  }
  0xdf   : > { %v689_v31 = vld [vmem:[#allocation2 + $0x8] sm:$0x1]  ;;  %v693_v32 = vld [vmem:[#allocation2 + $0x4] sm:$0xf]  ;;  %2919 = vmatpush3.bf16.msra.mxu1 %v3266_v4  ;;  %v3285_v4 = vld [vmem:[%s4393_s3 + $0xb0] sm:$0xff]  }
  0xe0   : > { %v690_v33 = vsel %vm4036_vm8, 0, %v689_v31  ;;  %845 = vmatpush1.bf16.msra.mxu0 %v3252_v30  ;;  %2920 = vmatprep.subr.bf16.mxu1 %v3267_v5  ;;  %v3284_v3 = vld [vmem:[%s4393_s3 + $0xa8] sm:$0xff]   ;;  %v1590_v29 = vld [vmem:[#allocation5] sm:$0x1]  ;;  %v3351_v1 = vld [vmem:[#allocation16 + $0x28] sm:$0xff]  }
  0xe1   : > { %v692_v34 = vld [vmem:[#allocation2] sm:$0xf]  ;;  %691 = vst [vmem:[#allocation2 + $0x8] sm:$0x1] %v690_v33  ;;  %846 = vmatprep.subr.bf16.mxu0 %v3644_v0  ;;  %v3367_v58 = vld [vmem:[#allocation17 + $0x20] sm:$0xff]  }
  0xe2   : > { %v2746_v36 = vcombine.low %v692_v34, %v693_v32  ;;  %v695_v37 = vld [vmem:[#allocation2] sm:$0xe]  ;;  %v3328_v34 = vld [vmem:[#allocation14 + $0x88] sm:$0xff]  }
  0xe3   : > { %v2748_v40 = vcombine.low %v695_v37, %v693_v32  ;;  %2921 = vmatpush3.bf16.msra.mxu1 %v3268_v6  ;;  %v3286_v6 = vld [vmem:[%s4393_s3 + $0xb8] sm:$0xff]  }
  0xe4   : > { %v708_v38 = vshll.u32 %v2746_v36, 16  ;;  %v706_v41 = vshrl.u32 %v2746_v36, 16  ;;  %847 = vmatpush1.bf16.msra.mxu0 %v3253_v35  ;;  %2922 = vmatprep.subr.bf16.mxu1 %v3269_v7  ;;  %v912_v35 = vld [vmem:[#allocation3] sm:$0xf] }
  0xe5   : > { %848 = vmatprep.subr.bf16.mxu0 %v3644_v0  ;;  %v723_v45 = vrot.slane %v2748_v40, 1 }
  0xe6   : > { %v710_v42 = vrot.slane %v708_v38, 1 }
  0xe7   : > { %2923 = vmatpush3.bf16.msra.mxu1 %v3270_v8 }
  0xe8   : > { %v3247_v44 = vld [vmem:[#allocation2 + $0x8] ss:$0 sps:$4 sm:$0x11]   ;;  %849 = vmatpush1.bf16.msra.mxu0 %v3254_v39  ;;  %v711_v46 = vor.u32 %v710_v42, %v706_v41  ;;  %2924 = vmatprep.subr.bf16.mxu1 %v3271_v9  ;;  %v916_v39 = vld [vmem:[#allocation3 + $0x8] sm:$0x1] }
  0xe9   : > { %v713_v47 = vshll.u32 %v3247_v44, 16  ;;  %850 = vmatprep.subr.bf16.mxu0 %v3644_v0  ;;  %v724_v48 = vrot.slane %v3247_v44, 1 }
  0xeb   : > { %v715_v49 = vrot.slane %v713_v47, 1  ;;  %v725_v51 = vsel %vm722_vm10, %v723_v45, %v724_v48  ;;  %2925 = vmatpush3.bf16.msra.mxu1 %v3272_v10 }
  0xec   : > { %851 = vmatpush1.bf16.msra.mxu0 %v3255_v43  ;;  %2762 = vmatprep.mubr.msk.bf16.mxu0 %vm726_vm11, %v725_v51 }
  0xed   : > { %v716_v52 = vsel %vm704_vm9, %v711_v46, %v715_v49  ;;  %852 = vmatprep.subr.bf16.mxu0 %v3644_v0  ;;  %2926 = vmatprep.subr.bf16.mxu1 %v3273_v11  ;;  %v3288_v11 = vld [vmem:[%s4404_s14] sm:$0xff]  }
  0xee   : > { %717 = vrot.lane.b32.xlu0 %v716_v52, %s3645_s30  ;;  %v3329_v46 = vld [vmem:[#allocation14 + $0x90] sm:$0xff]  }
  0xef   : > { %2927 = vmatpush3.bf16.msra.mxu1 %v3274_v12  ;;  %v3289_v12 = vld [vmem:[%s4404_s14 + $0x8] sm:$0xff]  }
  0xf0   : > { %853 = vmatpush1.bf16.msra.mxu0 %v3256_v50  ;;  %2928 = vmatprep.subr.bf16.mxu1 %v3275_v13  ;;  %v3290_v13 = vld [vmem:[%s4404_s14 + $0x10] sm:$0xff]  }
  0xf1   : > { %854 = vmatprep.subr.bf16.mxu0 %v3644_v0 }
  0xf3   : > { %2929 = vmatpush3.bf16.msra.mxu1 %v3276_v15  ;;  %v3291_v15 = vld [vmem:[%s4404_s14 + $0x18] sm:$0xff]  }
  0xf4   : > { %855 = vmatpush1.bf16.msra.mxu0 %v3257_v53  ;;  %3029 = vmatprep.subr.bf16.mxu1 %v3646_v16 }
  0xf5   : > { %856 = vmatprep.subr.bf16.mxu0 %v3644_v0 }
  0xf8   : > { %857 = vmatpush1.bf16.msra.mxu0 %v3258_v54 }
  0xf9   : > { %858 = vmatprep.subr.bf16.mxu0 %v3644_v0 }
  0xfc   : > { %859 = vmatpush1.bf16.msra.mxu0 %v3259_v55 }
  0xfd   : > { %3049 = vmatprep.subr.bf16.mxu0 %v3646_v16 }
 0x160   : > { %v718_v56 = vpop.permute.xlu0 %717 }
 0x161   : > { %v728_v57 = vsel %vm726_vm11, %v2746_v36, %v718_v56 }
 0x162   : > { %869 = vmatmul.mubr.bf16.vlgmr.msra.gmra.mrb[0].mxu0 %v728_v57 }
 0x163   : > { %3065 = vmatprep.mubr.msk.bf16.mxu0 %vm3647_vm14, %v3646_v16  ;;  %3050 = vmatpush3.bf16.msra.mxu0 %v3288_v11 }
 0x164   : > { %3051 = vmatprep.subr.bf16.mxu0 %v3646_v16 }
 0x167   : > { %3052 = vmatpush3.bf16.msra.mxu0 %v3289_v12 }
 0x168   : > { %3053 = vmatprep.subr.bf16.mxu0 %v3646_v16 }
 0x16b   : > { %3054 = vmatpush3.bf16.msra.mxu0 %v3290_v13 }
 0x16c   : > { %3055 = vmatprep.subr.bf16.mxu0 %v3646_v16 }
 0x16f   : > { %3056 = vmatpush3.bf16.msra.mxu0 %v3291_v15 }
 0x170   : > { %3057 = vmatprep.subr.bf16.mxu0 %v3646_v16 }
 0x235   : > { %v870_v18 = vpop.f32.mrb[0].mxu0 }
 0x236   : > { %v871_v19 = vadd.f32 %v2749_v17, %v870_v18  ;;  %v872_v20 = vpop.f32.mrb[1].mxu0  ;;  %v3293_v18 = vld [vmem:[%s4404_s14 + $0x28] sm:$0xff]  }
 0x237   : > { %v873_v21 = vpop.f32.mrb[2].mxu0  ;;  %v3295_v20 = vld [vmem:[%s4404_s14 + $0x38] sm:$0xff]  }
 0x238   : > { %v877_v23 = vmax.f32 %v871_v19, 0.0  ;;  %v874_v24 = vadd.f32 %v2749_v17, %v873_v21  ;;  %v875_v25 = vpop.f32.mrb[3].mxu0  ;;  %v3292_v17 = vld [vmem:[%s4404_s14 + $0x20] sm:$0xff]   ;;  %v3294_v19 = vld [vmem:[%s4404_s14 + $0x30] sm:$0xff]  }
 0x239   : > { %3058 = vmatpush3.bf16.msra.mxu0 %v3292_v17 }
 0x23a   : > { %v2908_v26 = vpack.c.bf16 %v877_v23, %v877_v23  ;;  %v878_v27 = vmax.f32 %v874_v24, 0.0  ;;  %3059 = vmatprep.subr.bf16.mxu0 %v3646_v16 }
 0x23c   : > { %v891_v28 = vshrl.u32 %v2908_v26, 16  ;;  %v2909_v30 = vpack.c.bf16 %v878_v27, %v878_v27  ;;  %v894_v32 = vshll.u32 %v2908_v26, 16 }
 0x23d   : > { %3060 = vmatpush3.bf16.msra.mxu0 %v3293_v18 }
 0x23e   : > { %v893_v31 = vrot.slane %v891_v28, 7  ;;  %v899_v33 = vshrl.u32 %v2909_v30, 16  ;;  %v902_v38 = vshll.u32 %v2909_v30, 16  ;;  %3061 = vmatprep.subr.bf16.mxu0 %v3646_v16  ;;  %v2768_v28 = vld [vmem:[%s4394_s4] ss:$0 sm:$0xff] }
 0x240   : > { %v896_v36 = vor.u32 %v894_v32, %v893_v31  ;;  %v901_v37 = vrot.slane %v899_v33, 7  ;;  %v897_v40 = vrot.slane %v893_v31, 4 }
 0x241   : > { %3062 = vmatpush3.bf16.msra.mxu0 %v3294_v19 }
 0x242   : > { %v913_v41 = vsel %vm4121_vm0, %v896_v36, %v912_v35  ;;  %v904_v42 = vor.u32 %v902_v38, %v901_v37  ;;  %v906_v43 = vrot.slane %v901_v37, 4  ;;  %3063 = vmatprep.subr.bf16.mxu0 %v3646_v16 }
 0x243   : > { %914 = vst [vmem:[#allocation3] sm:$0xf] %v913_v41 }
 0x244   : > { %v905_v44 = vsel %vm4016_vm6, %v897_v40, %v904_v42  ;;  %v917_v45 = vsel %vm4058_vm13, %v906_v43, %v916_v39 }
 0x245   : > { %915 = vst [vmem:[#allocation3 + $0x4] sm:$0xf] %v905_v44  ;;  %918 = vst [vmem:[#allocation3 + $0x8] sm:$0x1] %v917_v45  ;;  %3064 = vmatpush3.bf16.msra.mxu0 %v3295_v20 }
 0x246   : > { %3069 = vmatprep.subr.bf16.mxu0 %v3646_v16 }
 0x24a   : > { %v923_v48 = vld [vmem:[#allocation3] sm:$0xf] }
 0x24b   : > { %v926_v5 = vld [vmem:[#allocation3] sm:$0xe] }
 0x24c   : > { %v920_v47 = vld [vmem:[#allocation3 + $0x8] sm:$0x1]  ;;  %v924_v49 = vld [vmem:[#allocation3 + $0x4] sm:$0xf] }
 0x24d   : > { %v921_v50 = vsel %vm4133_vm1, 0, %v920_v47  ;;  %v2765_v51 = vcombine.low %v923_v48, %v924_v49  ;;  %v2767_v7 = vcombine.low %v926_v5, %v924_v49  ;;  %v1345_v48 = vld [vmem:[%s4458_s7] sm:$0xf]  ;;  %v1392_v49 = vld [vmem:[#allocation4] sm:$0x1] }
 0x24e   : > { %922 = vst [vmem:[#allocation3 + $0x8] sm:$0x1] %v921_v50  ;;  %v1393_v50 = vsel %vm4008_vm2, 0, %v1392_v49  ;;  %v3324_v49 = vld [vmem:[#allocation14 + $0x78] sm:$0xff]  }
 0x24f   : > { %v939_v14 = vshll.u32 %v2765_v51, 16  ;;  %v937_v54 = vshrl.u32 %v2765_v51, 16  ;;  %v952_v9 = vrot.slane %v2767_v7, 1  ;;  %1394 = vst [vmem:[#allocation4] sm:$0x1] %v1393_v50  ;;  %v3325_v50 = vld [vmem:[#allocation14 + $0x38] sm:$0xff]  }
 0x251   : > { %v941_v53 = vrot.slane %v939_v14, 1  ;;  %v3299_v14 = vld [vmem:[#allocation13 + $0x8] sm:$0xff]  }
 0x253   : > { %v942_v56 = vor.u32 %v941_v53, %v937_v54  ;;  %v3301_v53 = vld [vmem:[#allocation13 + $0x18] sm:$0xff]   ;;  %v3302_v54 = vld [vmem:[#allocation13 + $0x20] sm:$0xff]  }
 0x255   : > { %v3278_v52 = vld [vmem:[#allocation3 + $0x8] ss:$0 sps:$4 sm:$0x11]  }
 0x256   : > { %v944_v55 = vshll.u32 %v3278_v52, 16  ;;  %v953_v8 = vrot.slane %v3278_v52, 1  ;;  %v3300_v52 = vld [vmem:[#allocation13 + $0x10] sm:$0xff]  }
 0x258   : > { %v946_v57 = vrot.slane %v944_v55, 1  ;;  %v954_v10 = vsel %vm722_vm10, %v952_v9, %v953_v8  ;;  %v3303_v55 = vld [vmem:[#allocation13 + $0x28] sm:$0xff]   ;;  %vm2283_vm10 = vcmask 1042432  }
 0x259   : > { %v1408_v9 = vld [vmem:[#allocation4] sm:$0xf] }
 0x25a   : > { %v947_v60 = vsel %vm704_vm9, %v942_v56, %v946_v57  ;;  %v3304_v56 = vld [vmem:[#allocation13 + $0x30] sm:$0xff]   ;;  %v3305_v57 = vld [vmem:[#allocation13 + $0x38] sm:$0xff]  }
 0x25b   : > { %1187 = vmatprep.mubr.bf16.mxu1 %v947_v60  ;;  %v3307_v60 = vld [vmem:[#allocation13 + $0x48] sm:$0xff]  }
 0x25c   : > { %1188 = vmatmul.mubr.bf16.vlgmr.msra.gmra.mrb[0].mxu1 %v2765_v51  ;;  %v3298_v51 = vld [vmem:[#allocation13] sm:$0xff]  }
 0x25d   : > { %3030 = vmatpush3.bf16.msra.mxu1 %v3279_v59  ;;  %3045 = vmatprep.mubr.msk.bf16.mxu1 %vm3647_vm14, %v3646_v16  ;;  %v3306_v59 = vld [vmem:[#allocation13 + $0x40] sm:$0xff]  }
 0x25e   : > { %3031 = vmatprep.subr.bf16.mxu1 %v3646_v16 }
 0x261   : > { %3032 = vmatpush3.bf16.msra.mxu1 %v3280_v61  ;;  %v3308_v61 = vld [vmem:[#allocation13 + $0x50] sm:$0xff]  }
 0x262   : > { %3033 = vmatprep.subr.bf16.mxu1 %v3646_v16 }
 0x265   : > { %3034 = vmatpush3.bf16.msra.mxu1 %v3281_v62  ;;  %v3309_v62 = vld [vmem:[#allocation13 + $0x58] sm:$0xff]  }
 0x266   : > { %3035 = vmatprep.subr.bf16.mxu1 %v3646_v16 }
 0x269   : > { %3036 = vmatpush3.bf16.msra.mxu1 %v3282_v63 }
 0x26a   : > { %3037 = vmatprep.subr.bf16.mxu1 %v3646_v16 }
 0x26d   : > { %3038 = vmatpush3.bf16.msra.mxu1 %v3283_v2 }
 0x26e   : > { %3039 = vmatprep.subr.bf16.mxu1 %v3646_v16 }
 0x271   : > { %3040 = vmatpush3.bf16.msra.mxu1 %v3284_v3 }
 0x272   : > { %3041 = vmatprep.subr.bf16.mxu1 %v3646_v16 }
 0x275   : > { %3042 = vmatpush3.bf16.msra.mxu1 %v3285_v4 }
 0x276   : > { %3043 = vmatprep.subr.bf16.mxu1 %v3646_v16 }
 0x279   : > { %3044 = vmatpush3.bf16.msra.mxu1 %v3286_v6 }
 0x27a   : > { %1548 = vmatprep.subr.bf16.mxu1 %v3644_v0 }
 0x27c   : > { %3046 = vmatmul.mubr.bf16.vlgmr.msra.gmra.mrb[4].mxu1 %v954_v10  ;;  %v1411_v10 = vld [vmem:[#allocation4 + $0x4] sm:$0x1] }
 0x27d   : > { %1549 = vmatpush1.bf16.msra.mxu1 %v3298_v51  ;;  %v2805_v51 = vld [vmem:[%s4459_s20] ss:$0 sm:$0xff]  ;;  %s639_s20 = scalar_lea.vmem [#allocation19], %s2743_s21  ;;  %s3648_s21 = smov [#allocation19]  }
 0x27e   : > { %1550 = vmatprep.subr.bf16.mxu1 %v3644_v0  ;;  %s2607_s15 = sshll.u32 %s639_s20, 4  ;;  %s3558_s7 = sshll.u32 %s3648_s21, 4  ;;  %s4348_s15 = int_to_ptr.vmem [resolvable:$true] %s2607_s15  ;;  %s3559_s7 = int_to_ptr.vmem [resolvable:$false] %s3558_s7 }
 0x27f   : > { %p3561_p13 = scmp.lt.s32.totalorder %s4348_s15, %s3559_s7 }
 0x281   : > { %1551 = vmatpush1.bf16.msra.mxu1 %v3299_v14 }
 0x282   : > { %1552 = vmatprep.subr.bf16.mxu1 %v3644_v0 }
 0x285   : > { %1553 = vmatpush1.bf16.msra.mxu1 %v3300_v52 }
 0x286   : > { %1554 = vmatprep.subr.bf16.mxu1 %v3644_v0 }
 0x289   : > { %1555 = vmatpush1.bf16.msra.mxu1 %v3301_v53 }
 0x28a   : > { %1556 = vmatprep.subr.bf16.mxu1 %v3644_v0 }
 0x28d   : > { %1557 = vmatpush1.bf16.msra.mxu1 %v3302_v54 }
 0x28e   : > { %1558 = vmatprep.subr.bf16.mxu1 %v3644_v0 }
 0x291   : > { %1559 = vmatpush1.bf16.msra.mxu1 %v3303_v55 }
 0x292   : > { %1560 = vmatprep.subr.bf16.mxu1 %v3644_v0 }
 0x295   : > { %1561 = vmatpush1.bf16.msra.mxu1 %v3304_v56 }
 0x296   : > { %1562 = vmatprep.subr.bf16.mxu1 %v3644_v0 }
 0x299   : > { %1563 = vmatpush1.bf16.msra.mxu1 %v3305_v57 }
 0x29a   : > { %1564 = vmatprep.subr.bf16.mxu1 %v3644_v0 }
 0x29d   : > { %1565 = vmatpush1.bf16.msra.mxu1 %v3306_v59 }
 0x29e   : > { %1566 = vmatprep.subr.bf16.mxu1 %v3644_v0 }
 0x2a1   : > { %1567 = vmatpush1.bf16.msra.mxu1 %v3307_v60 }
 0x2a2   : > { %1568 = vmatprep.subr.bf16.mxu1 %v3644_v0 }
 0x2a5   : > { %1569 = vmatpush1.bf16.msra.mxu1 %v3308_v61 }
 0x2a6   : > { %1570 = vmatprep.subr.bf16.mxu1 %v3644_v0 }
 0x2a9   : > { %1571 = vmatpush1.bf16.msra.mxu1 %v3309_v62 }
 0x2aa   : > { %3095 = vmatprep.subr.bf16.mxu1 %v3646_v16 }
 0x32f   : > { %v2930_v21 = vpop.f32.mrb[0].mxu1 }
 0x330   : > { %v2931_v23 = vpop.f32.mrb[1].mxu1 }
 0x331   : > { %v2932_v24 = vadd.f32 %v2931_v23, %v2930_v21  ;;  %v2933_v25 = vpop.f32.mrb[2].mxu1 }
 0x332   : > { %v2934_v26 = vpop.f32.mrb[3].mxu1 }
 0x333   : > { %v2935_v27 = vadd.f32 %v2934_v26, %v2933_v25  ;;  %v1190_v30 = vadd.f32 %v2932_v24, %v2768_v28 }
 0x335   : > { %v1193_v35 = vadd.f32 %v2935_v27, %v2768_v28 }
 0x34f   : > { %v1230_v31 = vpop.f32.mrb[4].mxu1 }
 0x350   : > { %v1231_v32 = vadd.f32 %v1230_v31, %v1190_v30  ;;  %v3047_v33 = vpop.f32.mrb[5].mxu1 }
 0x351   : > { %v1233_v36 = vpop.f32.mrb[6].mxu1  ;;  %v3310_v33 = vld [vmem:[#allocation14 + $0x40] sm:$0xff]  }
 0x352   : > { %v1234_v37 = vadd.f32 %v1233_v36, %v1193_v35  ;;  %v3048_v38 = vpop.f32.mrb[7].mxu1  ;;  %v1237_v39 = vmax.f32 %v1231_v32, 0.0  ;;  %v1591_v32 = vsel %vm4058_vm13, 0, %v1590_v29  ;;  %v3311_v35 = vld [vmem:[#allocation14] sm:$0xff]   ;;  %v3312_v36 = vld [vmem:[#allocation14 + $0x48] sm:$0xff]   ;;  %v3341_v29 = vld [vmem:[%s4460_s23 + $0x28] sm:$0xff]  }
 0x353   : > { %1592 = vst [vmem:[#allocation5] sm:$0x1] %v1591_v32  ;;  %v3314_v38 = vld [vmem:[#allocation14 + $0x50] sm:$0xff]   ;;  %v3342_v32 = vld [vmem:[%s4460_s23 + $0x30] sm:$0xff]  }
 0x354   : > { %v1238_v40 = vmax.f32 %v1234_v37, 0.0  ;;  %v3313_v37 = vld [vmem:[#allocation14 + $0x8] sm:$0xff]  }
 0x356   : > { %v1239_v41 = vpack.c.bf16 %v1238_v40, %v1237_v39  ;;  %v3315_v39 = vld [vmem:[#allocation14 + $0x10] sm:$0xff]   ;;  %v3316_v40 = vld [vmem:[#allocation14 + $0x58] sm:$0xff]  }
 0x358   : > { %3066 = vmatmul.mubr.bf16.vlgmr.msra.gmra.mrb[4].mxu0 %v1239_v41  ;;  %v3317_v41 = vld [vmem:[#allocation14 + $0x18] sm:$0xff]  }
 0x359   : > { %3071 = vmatprep.mubr.msk.bf16.mxu0 %vm3647_vm14, %v3646_v16 }
 0x35a   : > { %v1606_v62 = vld [vmem:[#allocation5] sm:$0xf] }
 0x42b   : > { %v1338_v42 = vpop.f32.mrb[4].mxu0 }
 0x42c   : > { %v3067_v43 = vpop.f32.mrb[5].mxu0 }
 0x42d   : > { %v1341_v44 = vpop.f32.mrb[6].mxu0  ;;  %v3319_v43 = vld [vmem:[#allocation14 + $0x20] sm:$0xff]  }
 0x42e   : > { %v1346_v45 = vpack.c.bf16 %v1341_v44, %v1338_v42  ;;  %v3068_v47 = vpop.f32.mrb[7].mxu0  ;;  %v3318_v42 = vld [vmem:[#allocation14 + $0x60] sm:$0xff]   ;;  %v3320_v44 = vld [vmem:[#allocation14 + $0x68] sm:$0xff]  }
 0x42f   : > { %v3322_v47 = vld [vmem:[#allocation14 + $0x70] sm:$0xff]  }
 0x430   : > { %3070 = vmatpush3.bf16.msra.mxu0 %v1346_v45  ;;  %v3321_v45 = vld [vmem:[#allocation14 + $0x28] sm:$0xff]  }
 0x431   : > { %2956 = vmatprep.subr.bf16.mxu0 %v3310_v33  ;;  %v3343_v33 = vld [vmem:[%s4460_s23 + $0x38] sm:$0xff]  }
 0x433   : > { %3072 = vmatmul.mubr.msk.bf16.vlgmr.msra.gmra.mrb[8].mxu0 %vm1347_vm3, %v1345_v48  ;;  %v3323_v48 = vld [vmem:[#allocation14 + $0x30] sm:$0xff]  }
 0x434   : > { %2957 = vmatpush3.bf16.msra.mxu0 %v3311_v35 }
 0x435   : > { %2958 = vmatprep.subr.bf16.mxu0 %v3312_v36 }
 0x438   : > { %2959 = vmatpush3.bf16.msra.mxu0 %v3313_v37 }
 0x439   : > { %2960 = vmatprep.subr.bf16.mxu0 %v3314_v38 }
 0x43c   : > { %2961 = vmatpush3.bf16.msra.mxu0 %v3315_v39 }
 0x43d   : > { %2962 = vmatprep.subr.bf16.mxu0 %v3316_v40  ;;  %v2822_v40 = vld [vmem:[%s4461_s6] ss:$0 sm:$0xff]  ;;  %s2902_s6 = sshll.u32 %s3760_s0, 6  ;;  %s3554_s0 = scalar_lea.vmem %s4348_s15, 64 }
 0x43e   : > { %p3555_p7 = scmp.ne.s32.totalorder %s4348_s15, %s3554_s0 }
 0x440   : > { %2963 = vmatpush3.bf16.msra.mxu0 %v3317_v41  ;;  %p3556_p12 = pnand %p3555_p7, %p4466_p4 }
 0x441   : > { %2964 = vmatprep.subr.bf16.mxu0 %v3318_v42 }
 0x442   : > { %p3557_p1 = pneg %p3556_p12 }
 0x444   : > { %2965 = vmatpush3.bf16.msra.mxu0 %v3319_v43 }
 0x445   : > { %2966 = vmatprep.subr.bf16.mxu0 %v3320_v44 }
 0x448   : > { %2967 = vmatpush3.bf16.msra.mxu0 %v3321_v45 }
 0x449   : > { %2968 = vmatprep.subr.bf16.mxu0 %v3322_v47 }
 0x44c   : > { %2969 = vmatpush3.bf16.msra.mxu0 %v3323_v48 }
 0x44d   : > { %2970 = vmatprep.subr.bf16.mxu0 %v3324_v49 }
 0x450   : > { %2971 = vmatpush3.bf16.msra.mxu0 %v3325_v50 }
 0x451   : > { %3075 = vmatprep.subr.bf16.mxu0 %v3646_v16 }
 0x506   : > { %v1385_v63 = vpop.f32.mrb[8].mxu0 }
 0x507   : > { %v2910_v2 = vpack.c.bf16 %v1385_v63, %v1385_v63  ;;  %v3073_v3 = vpop.f32.mrb[9].mxu0  ;;  %v1609_v63 = vld [vmem:[#allocation5 + $0x4] sm:$0x1] }
 0x508   : > { %v1388_v4 = vpop.f32.mrb[10].mxu0 }
 0x509   : > { %v1399_v5 = vshrl.u32 %v2910_v2, 16  ;;  %v3074_v6 = vpop.f32.mrb[11].mxu0  ;;  %v1402_v8 = vshll.u32 %v2910_v2, 16 }
 0x50b   : > { %v1401_v7 = vrot.slane %v1399_v5, 7 }
 0x50d   : > { %v1404_v11 = vor.u32 %v1402_v8, %v1401_v7  ;;  %v1405_v12 = vrot.slane %v1401_v7, 4 }
 0x50f   : > { %v1409_v13 = vsel %vm4022_vm7, %v1404_v11, %v1408_v9  ;;  %v1412_v15 = vsel %vm4008_vm2, %v1405_v12, %v1411_v10  ;;  %vm2092_vm7 = vcmask 518146  }
 0x510   : > { %1410 = vst [vmem:[#allocation4] sm:$0xf] %v1409_v13  ;;  %1413 = vst [vmem:[#allocation4 + $0x4] sm:$0x1] %v1412_v15 }
 0x517   : > { %v1414_v17 = vld [vmem:[#allocation4 + $0x4] sm:$0x1]  ;;  %v1419_v20 = vld [vmem:[#allocation4] sm:$0xe] }
 0x518   : > { %v1415_v18 = vsel %vm4036_vm8, 0, %v1414_v17  ;;  %v1417_v21 = vld [vmem:[#allocation4] sm:$0xf]  ;;  %v3327_v17 = vld [vmem:[#allocation14 + $0x80] sm:$0xff]   ;;  %vm2093_vm8 = vsmask.f32 7946 }
 0x519   : > { %1416 = vst [vmem:[#allocation4 + $0x4] sm:$0x1] %v1415_v18  ;;  %v3330_v18 = vld [vmem:[#allocation14 + $0x98] sm:$0xff]   ;;  %vm2094_vm9 = vmand %vm2092_vm7, %vm2093_vm8 }
 0x520   : > { %v1418_v19 = vld [vmem:[#allocation4 + $0x4] sm:$0x1] }
 0x521   : > { %v2804_v23 = vcombine.low %v1419_v20, %v1418_v19  ;;  %v2803_v24 = vcombine.low %v1417_v21, %v1418_v19  ;;  %v3331_v19 = vld [vmem:[#allocation14 + $0xa0] sm:$0xff]   ;;  %v3332_v20 = vld [vmem:[#allocation14 + $0xa8] sm:$0xff]  }
 0x523   : > { %v1437_v25 = vrot.slane %v2804_v23, 1  ;;  %v1428_v26 = vshll.u32 %v2803_v24, 16  ;;  %v1426_v22 = vshrl.u32 %v2803_v24, 16  ;;  %v3334_v23 = vld [vmem:[#allocation14 + $0xb8] sm:$0xff]  }
 0x525   : > { %2818 = vmatprep.mubr.msk.bf16.mxu1 %vm726_vm11, %v1437_v25  ;;  %v1430_v27 = vrot.slane %v1428_v26, 1 }
 0x527   : > { %v1431_v28 = vor.u32 %v1430_v27, %v1426_v22  ;;  %v3336_v22 = vld [vmem:[%s4460_s23] sm:$0xff]   ;;  %v3337_v27 = vld [vmem:[%s4460_s23 + $0x8] sm:$0xff]  }
 0x529   : > { %1432 = vrot.lane.b32.xlu0 %v1431_v28, %s3645_s30  ;;  %v3338_v28 = vld [vmem:[%s4460_s23 + $0x10] sm:$0xff]  }
 0x59b   : > { %v1433_v30 = vpop.permute.xlu0 %1432 }
 0x59c   : > { %v1440_v31 = vsel %vm726_vm11, %v1417_v21, %v1433_v30  ;;  %v3333_v21 = vld [vmem:[#allocation14 + $0xb0] sm:$0xff]   ;;  %v3339_v30 = vld [vmem:[%s4460_s23 + $0x18] sm:$0xff]  }
 0x59d   : > { %1581 = vmatmul.mubr.bf16.vlgmr.msra.gmra.mrb[8].mxu1 %v1440_v31  ;;  %v3340_v31 = vld [vmem:[%s4460_s23 + $0x20] sm:$0xff]  }
 0x59e   : > { %3111 = vmatprep.mubr.msk.bf16.mxu1 %vm3647_vm14, %v3646_v16  ;;  %3096 = vmatpush3.bf16.msra.mxu1 %v3336_v22 }
 0x59f   : > { %3097 = vmatprep.subr.bf16.mxu1 %v3646_v16 }
 0x5a2   : > { %3098 = vmatpush3.bf16.msra.mxu1 %v3337_v27 }
 0x5a3   : > { %3099 = vmatprep.subr.bf16.mxu1 %v3646_v16 }
 0x5a6   : > { %3100 = vmatpush3.bf16.msra.mxu1 %v3338_v28 }
 0x5a7   : > { %3101 = vmatprep.subr.bf16.mxu1 %v3646_v16 }
 0x5aa   : > { %3102 = vmatpush3.bf16.msra.mxu1 %v3339_v30 }
 0x5ab   : > { %3103 = vmatprep.subr.bf16.mxu1 %v3646_v16 }
 0x5ae   : > { %3104 = vmatpush3.bf16.msra.mxu1 %v3340_v31  ;;  %v2269_v31 = vld [vmem:[#allocation7] sm:$0x1] }
 0x5af   : > { %3105 = vmatprep.subr.bf16.mxu1 %v3646_v16 }
 0x5b2   : > { %3106 = vmatpush3.bf16.msra.mxu1 %v3341_v29  ;;  %v2270_v29 = vsel %vm4058_vm13, 0, %v2269_v31 }
 0x5b3   : > { %3107 = vmatprep.subr.bf16.mxu1 %v3646_v16  ;;  %2271 = vst [vmem:[#allocation7] sm:$0x1] %v2270_v29 }
 0x5b6   : > { %3108 = vmatpush3.bf16.msra.mxu1 %v3342_v32  ;;  %v3358_v32 = vld [vmem:[#allocation17 + $0x40] sm:$0xff]  }
 0x5b7   : > { %3109 = vmatprep.subr.bf16.mxu1 %v3646_v16 }
 0x5ba   : > { %3110 = vmatpush3.bf16.msra.mxu1 %v3343_v33  ;;  %v3359_v33 = vld [vmem:[#allocation17] sm:$0xff]  }
 0x5bb   : > { %2998 = vmatprep.subr.bf16.mxu1 %v3358_v32 }
 0x670   : > { %v1582_v14 = vpop.f32.mrb[8].mxu1 }
 0x671   : > { %v1583_v52 = vadd.f32 %v2805_v51, %v1582_v14  ;;  %v1584_v53 = vpop.f32.mrb[9].mxu1 }
 0x672   : > { %v1585_v54 = vpop.f32.mrb[10].mxu1 }
 0x673   : > { %v1588_v55 = vmax.f32 %v1583_v52, 0.0  ;;  %v1586_v56 = vpop.f32.mrb[11].mxu1 }
 0x674   : > { %v2072_v56 = vld [vmem:[#allocation6] sm:$0x1] }
 0x675   : > { %v2911_v57 = vpack.c.bf16 %v1588_v55, %v1588_v55  ;;  %v2021_v55 = vld [vmem:[%s4462_s22] sm:$0x3] }
 0x677   : > { %v1597_v59 = vshrl.u32 %v2911_v57, 16  ;;  %v1600_v61 = vshll.u32 %v2911_v57, 16  ;;  %v2073_v57 = vsel %vm4008_vm2, 0, %v2072_v56  ;;  %vm2086_vm2 = vcmask 518144  }
 0x678   : > { %2074 = vst [vmem:[#allocation6] sm:$0x1] %v2073_v57  ;;  %vm2088_vm6 = vmand %vm2086_vm2, %vm2087_vm5 }
 0x679   : > { %v1599_v60 = vrot.slane %v1597_v59, 7  ;;  %v3346_v59 = vld [vmem:[#allocation16] sm:$0xff]  }
 0x67b   : > { %v1602_v2 = vor.u32 %v1600_v61, %v1599_v60  ;;  %v1603_v3 = vrot.slane %v1599_v60, 4  ;;  %v3347_v60 = vld [vmem:[#allocation16 + $0x8] sm:$0xff]   ;;  %v3348_v61 = vld [vmem:[#allocation16 + $0x10] sm:$0xff]  }
 0x67d   : > { %v1607_v4 = vsel %vm4121_vm0, %v1602_v2, %v1606_v62  ;;  %v1610_v5 = vsel %vm4058_vm13, %v1603_v3, %v1609_v63  ;;  %v3349_v62 = vld [vmem:[#allocation16 + $0x18] sm:$0xff]   ;;  %v3350_v63 = vld [vmem:[#allocation16 + $0x20] sm:$0xff]   ;;  %v3352_v2 = vld [vmem:[#allocation16 + $0x30] sm:$0xff]  }
 0x67e   : > { %1608 = vst [vmem:[#allocation5] sm:$0xf] %v1607_v4  ;;  %1611 = vst [vmem:[#allocation5 + $0x4] sm:$0x1] %v1610_v5  ;;  %v3353_v3 = vld [vmem:[#allocation16 + $0x38] sm:$0xff]   ;;  %v3354_v4 = vld [vmem:[#allocation16 + $0x40] sm:$0xff]  }
 0x67f   : > { %v3355_v5 = vld [vmem:[#allocation16 + $0x48] sm:$0xff]   ;;  %vm2289_vm13 = vmand %vm2288_vm12, %vm2093_vm8 }
 0x685   : > { %v1612_v6 = vld [vmem:[#allocation5 + $0x4] sm:$0x1]  ;;  %v1615_v8 = vld [vmem:[#allocation5] sm:$0xf] }
 0x686   : > { %v1613_v7 = vsel %vm4133_vm1, 0, %v1612_v6  ;;  %v1617_v24 = vld [vmem:[#allocation5] sm:$0xe] }
 0x687   : > { %1614 = vst [vmem:[#allocation5 + $0x4] sm:$0x1] %v1613_v7  ;;  %v3356_v6 = vld [vmem:[#allocation16 + $0x50] sm:$0xff]   ;;  %v3357_v7 = vld [vmem:[#allocation16 + $0x58] sm:$0xff]  }
 0x68e   : > { %v1616_v9 = vld [vmem:[#allocation5 + $0x4] sm:$0x1] }
 0x68f   : > { %v2820_v10 = vcombine.low %v1615_v8, %v1616_v9  ;;  %v2821_v25 = vcombine.low %v1617_v24, %v1616_v9 }
 0x691   : > { %v1626_v11 = vshll.u32 %v2820_v10, 16  ;;  %v1624_v12 = vshrl.u32 %v2820_v10, 16  ;;  %v1634_v26 = vrot.slane %v2821_v25, 1 }
 0x693   : > { %v1628_v13 = vrot.slane %v1626_v11, 1 }
 0x695   : > { %v1629_v15 = vor.u32 %v1628_v13, %v1624_v12 }
 0x697   : > { %1867 = vmatprep.mubr.bf16.mxu0 %v1629_v15 }
 0x698   : > { %1868 = vmatmul.mubr.bf16.vlgmr.msra.gmra.mrb[12].mxu0 %v1615_v8 }
 0x699   : > { %3076 = vmatpush3.bf16.msra.mxu0 %v3327_v17  ;;  %3091 = vmatprep.mubr.msk.bf16.mxu0 %vm3647_vm14, %v3646_v16 }
 0x69a   : > { %3077 = vmatprep.subr.bf16.mxu0 %v3646_v16 }
 0x69d   : > { %3078 = vmatpush3.bf16.msra.mxu0 %v3328_v34  ;;  %v2089_v34 = vld [vmem:[#allocation6] sm:$0x7] }
 0x69e   : > { %3079 = vmatprep.subr.bf16.mxu0 %v3646_v16 }
 0x6a1   : > { %3080 = vmatpush3.bf16.msra.mxu0 %v3329_v46 }
 0x6a2   : > { %3081 = vmatprep.subr.bf16.mxu0 %v3646_v16 }
 0x6a5   : > { %3082 = vmatpush3.bf16.msra.mxu0 %v3330_v18 }
 0x6a6   : > { %3083 = vmatprep.subr.bf16.mxu0 %v3646_v16 }
 0x6a9   : > { %3084 = vmatpush3.bf16.msra.mxu0 %v3331_v19 }
 0x6aa   : > { %3085 = vmatprep.subr.bf16.mxu0 %v3646_v16 }
 0x6ad   : > { %3086 = vmatpush3.bf16.msra.mxu0 %v3332_v20 }
 0x6ae   : > { %3087 = vmatprep.subr.bf16.mxu0 %v3646_v16 }
 0x6b1   : > { %3088 = vmatpush3.bf16.msra.mxu0 %v3333_v21 }
 0x6b2   : > { %3089 = vmatprep.subr.bf16.mxu0 %v3646_v16 }
 0x6b5   : > { %3090 = vmatpush3.bf16.msra.mxu0 %v3334_v23 }
 0x6b6   : > { %3115 = vmatprep.subr.bf16.mxu0 %v3646_v16 }
 0x6b8   : > { %3092 = vmatmul.mubr.bf16.vlgmr.msra.gmra.mrb[16].mxu0 %v1634_v26 }
 0x6b9   : > { %3117 = vmatprep.mubr.msk.bf16.mxu0 %vm3647_vm14, %v3646_v16 }
 0x76b   : > { %v2972_v35 = vpop.f32.mrb[12].mxu0 }
 0x76c   : > { %v2973_v36 = vpop.f32.mrb[13].mxu0 }
 0x76d   : > { %v2974_v37 = vadd.f32 %v2973_v36, %v2972_v35  ;;  %v2975_v38 = vpop.f32.mrb[14].mxu0  ;;  %v3360_v35 = vld [vmem:[#allocation17 + $0x48] sm:$0xff]  }
 0x76e   : > { %v2976_v39 = vpop.f32.mrb[15].mxu0  ;;  %v3361_v36 = vld [vmem:[#allocation17 + $0x8] sm:$0xff]   ;;  %v3363_v38 = vld [vmem:[#allocation17 + $0x10] sm:$0xff]  }
 0x76f   : > { %v1870_v41 = vadd.f32 %v2974_v37, %v2822_v40  ;;  %v3362_v37 = vld [vmem:[#allocation17 + $0x50] sm:$0xff]   ;;  %v3364_v39 = vld [vmem:[#allocation17 + $0x58] sm:$0xff]  }
 0x770   : > { %v3365_v40 = vld [vmem:[#allocation17 + $0x18] sm:$0xff]  }
 0x78b   : > { %v1909_v42 = vpop.f32.mrb[16].mxu0 }
 0x78c   : > { %v1910_v43 = vadd.f32 %v1909_v42, %v1870_v41  ;;  %v3093_v44 = vpop.f32.mrb[17].mxu0  ;;  %v3366_v41 = vld [vmem:[#allocation17 + $0x60] sm:$0xff]   ;;  %v3368_v42 = vld [vmem:[#allocation17 + $0x68] sm:$0xff]  }
 0x78d   : > { %v1912_v45 = vpop.f32.mrb[18].mxu0  ;;  %v3370_v44 = vld [vmem:[#allocation17 + $0x70] sm:$0xff]  }
 0x78e   : > { %v1915_v47 = vmax.f32 %v1910_v43, 0.0  ;;  %v3094_v48 = vpop.f32.mrb[19].mxu0  ;;  %v3369_v43 = vld [vmem:[#allocation17 + $0x28] sm:$0xff]   ;;  %v3371_v45 = vld [vmem:[#allocation17 + $0x30] sm:$0xff]  }
 0x78f   : > { %v3373_v48 = vld [vmem:[#allocation17 + $0x38] sm:$0xff]  }
 0x790   : > { %v1916_v49 = vpack.c.bf16 %v1915_v47, %v1915_v47  ;;  %v3372_v47 = vld [vmem:[#allocation17 + $0x78] sm:$0xff]  }
 0x792   : > { %3112 = vmatmul.mubr.bf16.vlgmr.msra.gmra.mrb[12].mxu1 %v1916_v49  ;;  %v2859_v49 = vld [vmem:[%s4463_s29] ss:$0 sm:$0xff]  ;;  %s4346_s29 = scalar_lea.hbm %s4465_s16, %s2902_s6 }
 0x793   : > { %2999 = vmatpush3.bf16.msra.mxu1 %v3359_v33 }
 0x794   : > { %3000 = vmatprep.subr.bf16.mxu1 %v3360_v35 }
 0x797   : > { %3001 = vmatpush3.bf16.msra.mxu1 %v3361_v36 }
 0x798   : > { %3002 = vmatprep.subr.bf16.mxu1 %v3362_v37 }
 0x79b   : > { %3003 = vmatpush3.bf16.msra.mxu1 %v3363_v38 }
 0x79c   : > { %3004 = vmatprep.subr.bf16.mxu1 %v3364_v39 }
 0x79f   : > { %3005 = vmatpush3.bf16.msra.mxu1 %v3365_v40 }
 0x7a0   : > { %3006 = vmatprep.subr.bf16.mxu1 %v3366_v41 }
 0x7a3   : > { %3007 = vmatpush3.bf16.msra.mxu1 %v3367_v58 }
 0x7a4   : > { %3008 = vmatprep.subr.bf16.mxu1 %v3368_v42 }
 0x7a7   : > { %3009 = vmatpush3.bf16.msra.mxu1 %v3369_v43 }
 0x7a8   : > { %3010 = vmatprep.subr.bf16.mxu1 %v3370_v44 }
 0x7ab   : > { %3011 = vmatpush3.bf16.msra.mxu1 %v3371_v45 }
 0x7ac   : > { %3012 = vmatprep.subr.bf16.mxu1 %v3372_v47 }
 0x7af   : > { %3013 = vmatpush3.bf16.msra.mxu1 %v3373_v48 }
 0x7b0   : > { %3121 = vmatprep.subr.bf16.mxu1 %v3646_v16 }
 0x865   : > { %v2015_v50 = vpop.f32.mrb[12].mxu1 }
 0x866   : > { %v2022_v51 = vpack.c.bf16 %v2015_v50, %v2015_v50  ;;  %v3113_v14 = vpop.f32.mrb[13].mxu1 }
 0x867   : > { %v2018_v52 = vpop.f32.mrb[14].mxu1 }
 0x868   : > { %v2029_v53 = vsel %vm910_vm15, %v2022_v51, 0  ;;  %v3114_v54 = vpop.f32.mrb[15].mxu1 }
 0x869   : > { %3116 = vmatpush3.bf16.msra.mxu0 %v2029_v53 }
 0x86a   : > { %2227 = vmatprep.subr.bf16.mxu0 %v3644_v0 }
 0x86c   : > { %3118 = vmatmul.mubr.msk.bf16.vlgmr.msra.gmra.mrb[20].mxu0 %vm2023_vm4, %v2021_v55 }
 0x86d   : > { %2228 = vmatpush1.bf16.msra.mxu0 %v3346_v59 }
 0x86e   : > { %2229 = vmatprep.subr.bf16.mxu0 %v3644_v0 }
 0x871   : > { %2230 = vmatpush1.bf16.msra.mxu0 %v3347_v60  ;;  %v2285_v60 = vld [vmem:[#allocation7] sm:$0x7] }
 0x872   : > { %2231 = vmatprep.subr.bf16.mxu0 %v3644_v0 }
 0x875   : > { %2232 = vmatpush1.bf16.msra.mxu0 %v3348_v61 }
 0x876   : > { %2233 = vmatprep.subr.bf16.mxu0 %v3644_v0 }
 0x879   : > { %2234 = vmatpush1.bf16.msra.mxu0 %v3349_v62 }
 0x87a   : > { %2235 = vmatprep.subr.bf16.mxu0 %v3644_v0 }
 0x87d   : > { %2236 = vmatpush1.bf16.msra.mxu0 %v3350_v63 }
 0x87e   : > { %2237 = vmatprep.subr.bf16.mxu0 %v3644_v0 }
 0x881   : > { %2238 = vmatpush1.bf16.msra.mxu0 %v3351_v1 }
 0x882   : > { %2239 = vmatprep.subr.bf16.mxu0 %v3644_v0 }
 0x885   : > { %2240 = vmatpush1.bf16.msra.mxu0 %v3352_v2 }
 0x886   : > { %2241 = vmatprep.subr.bf16.mxu0 %v3644_v0 }
 0x889   : > { %2242 = vmatpush1.bf16.msra.mxu0 %v3353_v3 }
 0x88a   : > { %2243 = vmatprep.subr.bf16.mxu0 %v3644_v0 }
 0x88d   : > { %2244 = vmatpush1.bf16.msra.mxu0 %v3354_v4 }
 0x88e   : > { %2245 = vmatprep.subr.bf16.mxu0 %v3644_v0 }
 0x891   : > { %2246 = vmatpush1.bf16.msra.mxu0 %v3355_v5 }
 0x892   : > { %2247 = vmatprep.subr.bf16.mxu0 %v3644_v0 }
 0x895   : > { %2248 = vmatpush1.bf16.msra.mxu0 %v3356_v6 }
 0x896   : > { %2249 = vmatprep.subr.bf16.mxu0 %v3644_v0 }
 0x899   : > { %2250 = vmatpush1.bf16.msra.mxu0 %v3357_v7  ;;  %v3375_v7 = vld [vmem:[#allocation17 + $0x80] sm:$0xff]  }
 0x93f   : > { %v2065_v8 = vpop.f32.mrb[20].mxu0 }
 0x940   : > { %v2912_v9 = vpack.c.bf16 %v2065_v8, %v2065_v8  ;;  %v3119_v10 = vpop.f32.mrb[21].mxu0 }
 0x941   : > { %v2068_v11 = vpop.f32.mrb[22].mxu0  ;;  %v3377_v10 = vld [vmem:[#allocation17 + $0x90] sm:$0xff]  }
 0x942   : > { %v2079_v12 = vshrl.u32 %v2912_v9, 16  ;;  %v3120_v13 = vpop.f32.mrb[23].mxu0  ;;  %v2082_v17 = vshll.u32 %v2912_v9, 16  ;;  %v3376_v9 = vld [vmem:[#allocation17 + $0x88] sm:$0xff]   ;;  %v3378_v11 = vld [vmem:[#allocation17 + $0x98] sm:$0xff]  }
 0x943   : > { %v3380_v13 = vld [vmem:[#allocation17 + $0xa8] sm:$0xff]  }
 0x944   : > { %v2081_v15 = vrot.slane %v2079_v12, 7  ;;  %v3379_v12 = vld [vmem:[#allocation17 + $0xa0] sm:$0xff]  }
 0x946   : > { %v2084_v46 = vor.u32 %v2082_v17, %v2081_v15  ;;  %v3381_v15 = vld [vmem:[#allocation17 + $0xb0] sm:$0xff]   ;;  %v3382_v17 = vld [vmem:[#allocation17 + $0xb8] sm:$0xff]  }
 0x948   : > { %v2090_v18 = vsel %vm2088_vm6, %v2084_v46, %v2089_v34 }
 0x949   : > { %2091 = vst [vmem:[#allocation6] sm:$0x7] %v2090_v18 }
 0x950   : > { %v2095_v0 = vld [vmem:[#allocation6] sm:$0x4]  ;;  %v3344_v20 = vld [vmem:[#allocation6] ss:$0 sps:$4 sm:$0x66]  }
 0x951   : > { %v2096_v19 = vsel %vm2094_vm9, 0, %v2095_v0  ;;  %v3345_v21 = vld [vmem:[#allocation6] ss:$0 sps:$4 sm:$0x77]   ;;  %v2116_v23 = vrot.slane %v3344_v20, 1 }
 0x952   : > { %2097 = vst [vmem:[#allocation6] sm:$0x4] %v2096_v19  ;;  %v2107_v24 = vshll.u32 %v3345_v21, 16  ;;  %v2105_v25 = vshrl.u32 %v3345_v21, 16  ;;  %v2098_v27 = vld [vmem:[#allocation6] sm:$0x3] }
 0x953   : > { %2872 = vmatprep.mubr.msk.bf16.mxu0 %vm726_vm11, %v2116_v23  ;;  %v2876_v23 = vld [vmem:[%s4464_s10] ss:$0 sm:$0xff]  ;;  %s3560_s10 = scalar_lea.vmem %s3559_s7, 128 }
 0x954   : > { %v2109_v26 = vrot.slane %v2107_v24, 1  ;;  %p3562_p0 = scmp.lt.s32.totalorder %s3560_s10, %s3554_s0 }
 0x956   : > { %v2110_v22 = vor.u32 %v2109_v26, %v2105_v25  ;;  %p3563_p2 = por %p3562_p0, %p3561_p13 }
 0x958   : > { %2111 = vrot.lane.b32.xlu1 %v2110_v22, %s3645_s30  ;;  %p3564_p8 = pnand %p3563_p2, %p3557_p1 }
 0x9ca   : > { %v2112_v28 = vpop.permute.xlu1 %2111 }
 0x9cb   : > { %v2119_v30 = vsel %vm726_vm11, %v2098_v27, %v2112_v28  ;;  %vm2284_vm11 = vmand %vm2283_vm10, %vm2087_vm5 }
 0x9cc   : > { %2260 = vmatmul.mubr.bf16.vlgmr.msra.gmra.mrb[24].mxu0 %v2119_v30 }
 0xa9f   : > { %v2261_v50 = vpop.f32.mrb[24].mxu0 }
 0xaa0   : > { %v2262_v51 = vadd.f32 %v2859_v49, %v2261_v50  ;;  %v2263_v14 = vpop.f32.mrb[25].mxu0 }
 0xaa1   : > { %v2264_v52 = vpop.f32.mrb[26].mxu0 }
 0xaa2   : > { %v2267_v53 = vmax.f32 %v2262_v51, 0.0  ;;  %v2265_v54 = vpop.f32.mrb[27].mxu0 }
 0xaa4   : > { %v2913_v55 = vpack.c.bf16 %v2267_v53, %v2267_v53 }
 0xaa6   : > { %v2276_v56 = vshrl.u32 %v2913_v55, 16  ;;  %v2279_v59 = vshll.u32 %v2913_v55, 16 }
 0xaa8   : > { %v2278_v57 = vrot.slane %v2276_v56, 7 }
 0xaaa   : > { %v2281_v61 = vor.u32 %v2279_v59, %v2278_v57 }
 0xaac   : > { %v2286_v62 = vsel %vm2284_vm11, %v2281_v61, %v2285_v60 }
 0xaad   : > { %2287 = vst [vmem:[#allocation7] sm:$0x7] %v2286_v62 }
 0xab4   : > { %v2290_v63 = vld [vmem:[#allocation7] sm:$0x4]  ;;  %v3374_v2 = vld [vmem:[#allocation7] ss:$0 sps:$4 sm:$0x77]  }
 0xab5   : > { %v2291_v1 = vsel %vm2289_vm13, 0, %v2290_v63  ;;  %v2302_v3 = vshll.u32 %v3374_v2, 16  ;;  %v2300_v4 = vshrl.u32 %v3374_v2, 16  ;;  %v2293_v8 = vld [vmem:[#allocation7] sm:$0x3] }
 0xab6   : > { %2292 = vst [vmem:[#allocation7] sm:$0x4] %v2291_v1  ;;  %v3383_v34 = vld [vmem:[#allocation7] ss:$0 sps:$4 sm:$0x66]  }
 0xab7   : > { %v2304_v5 = vrot.slane %v2302_v3, 1  ;;  %v2310_v46 = vrot.slane %v3383_v34, 1 }
 0xab9   : > { %v2305_v6 = vor.u32 %v2304_v5, %v2300_v4 }
 0xabb   : > { %2543 = vmatprep.mubr.bf16.mxu1 %v2305_v6 }
 0xabc   : > { %2544 = vmatmul.mubr.bf16.vlgmr.msra.gmra.mrb[16].mxu1 %v2293_v8 }
 0xabd   : > { %3122 = vmatpush3.bf16.msra.mxu1 %v3375_v7  ;;  %3137 = vmatprep.mubr.msk.bf16.mxu1 %vm3647_vm14, %v3646_v16 }
 0xabe   : > { %3123 = vmatprep.subr.bf16.mxu1 %v3646_v16 }
 0xac1   : > { %3124 = vmatpush3.bf16.msra.mxu1 %v3376_v9 }
 0xac2   : > { %3125 = vmatprep.subr.bf16.mxu1 %v3646_v16 }
 0xac5   : > { %3126 = vmatpush3.bf16.msra.mxu1 %v3377_v10 }
 0xac6   : > { %3127 = vmatprep.subr.bf16.mxu1 %v3646_v16 }
 0xac9   : > { %3128 = vmatpush3.bf16.msra.mxu1 %v3378_v11 }
 0xaca   : > { %3129 = vmatprep.subr.bf16.mxu1 %v3646_v16 }
 0xacd   : > { %3130 = vmatpush3.bf16.msra.mxu1 %v3379_v12 }
 0xace   : > { %3131 = vmatprep.subr.bf16.mxu1 %v3646_v16 }
 0xad1   : > { %3132 = vmatpush3.bf16.msra.mxu1 %v3380_v13 }
 0xad2   : > { %3133 = vmatprep.subr.bf16.mxu1 %v3646_v16 }
 0xad5   : > { %3134 = vmatpush3.bf16.msra.mxu1 %v3381_v15 }
 0xad6   : > { %3135 = vmatprep.subr.bf16.mxu1 %v3646_v16 }
 0xad9   : > { %3136 = vmatpush3.bf16.msra.mxu1 %v3382_v17 }
 0xadc   : > { %3138 = vmatmul.mubr.bf16.vlgmr.msra.gmra.mrb[20].mxu1 %v2310_v46 }
 0xb8f   : > { %v3014_v18 = vpop.f32.mrb[16].mxu1 }
 0xb90   : > { %v3015_v0 = vpop.f32.mrb[17].mxu1 }
 0xb91   : > { %v3016_v19 = vadd.f32 %v3015_v0, %v3014_v18  ;;  %v3017_v20 = vpop.f32.mrb[18].mxu1 }
 0xb92   : > { %v3018_v21 = vpop.f32.mrb[19].mxu1 }
 0xb93   : > { %v2546_v24 = vadd.f32 %v3016_v19, %v2876_v23 }
 0xbaf   : > { %v2585_v25 = vpop.f32.mrb[20].mxu1 }
 0xbb0   : > { %v2586_v16 = vadd.f32 %v2585_v25, %v2546_v24  ;;  %v3139_v26 = vpop.f32.mrb[21].mxu1 }
 0xbb1   : > { %v2588_v22 = vpop.f32.mrb[22].mxu1 }
 0xbb2   : > { %v2591_v27 = vmax.f32 %v2586_v16, 0.0  ;;  %v3140_v28 = vpop.f32.mrb[23].mxu1 }
 0xbb4   : > { %2592 = vst [vmem:[%s639_s20] sm:$0xf] %v2591_v27 }
 0xbb5   : > { %3567 = shalt.err (!%p3564_p8)
}
 0xbb6   : > { %s3568_s13 = scalar_lea.hbm %s4346_s29, 64  ;;  %s3572_s22 = scalar_lea.hbm %s4465_s16, 128 }
 0xbb7   : > { %p3569_p6 = scmp.ne.s32.totalorder %s4346_s29, %s3568_s13  ;;  %p3573_p3 = scmp.lt.u32.totalorder %s4346_s29, %s4465_s16 }
 0xbb8   : > { %p3574_p5 = scmp.lt.u32.totalorder %s3572_s22, %s3568_s13  ;;  %p3576_p7 = scmp.lt.u32.totalorder %s3568_s13, %s4346_s29 }
 0xbb9   : > { %p3570_p10 = pnand %p3569_p6, %p4466_p4 }
 0xbba   : > { %p3575_p9 = por %p3574_p5, %p3573_p3 }
 0xbbb   : > { %p3571_p11 = pneg %p3570_p10 }
 0xbbc   : > { %p3577_p12 = por %p3576_p7, %p3575_p9 }
 0xbbe   : > { %p3578_p1 = pnand %p3577_p12, %p3571_p11 }
 0xbc0   : > { %3581 = shalt.err (!%p3578_p1)
}
 0xbc1   : > { %3163 = dma.vmem_to_hbm [thread:$0]  (%p4466_p4), %s4348_s15, 64, %s4346_s29, %s2594_s1  }
 0xbc2 PF: > { %s2619_s0 = sand.u32 1, %s3620_s24   ;;  %p4467_p13 = scmp.ne.s32.totalorder %s4434_s17, 0 }
 0xbc3   : > { %p4468_p0 = scmp.ge.s32.totalorder %s3632_s27, 2  ;;  %s2620_s7 = scalar_lea.sflag [#allocation10], %s2619_s0 }
 0xbc5   : > { %p3186_p2 = pnand %p4468_p0, %p4467_p13 }
 0xbc7   : > { %3615 = dma.done.wait (!%p3186_p2), %s2620_s7, 64  }
 0xbc8   : > { %3617 = vsyncadd (!%p3186_p2), %s2620_s7, 4294967232  ;;  %p33_p8 = scmp.ge.s32.totalorder %s3912_s18, 4   ;;  %s4469_s24 = smov %s3624_s25 }
 0xbc9   : > { %s4470_s25 = smov %s3628_s26  ;;  %s4471_s26 = smov %s3924_s8 }
 0xbca   : > { %s4472_s27 = smov %s3912_s18  ;;  %35 = sbr.rel (!%p33_p8) target bundleno = 20 (0x14), region = 153 }
 0xbd1   :  { %2625 = vsyncpa [#allocation9], 1 }
 0xbd2   :  { %2627 = vsyncpa [#allocation9 + $0x1], 1 }
 0xbd3   :  { %2628 = vsyncpa [#allocation12], 1 }
 0xbd4   :  { %2629 = vsyncpa [#allocation15], 1 }
 0xbd5   :  { %2630 = vsyncpa [#allocation18], 1 }
 0xbd6   :  { %2631 = vsyncpa [#allocation10], 1 }
 0xbd7   :  { %2633 = vsyncpa [#allocation10 + $0x1], 1 }

</bundles_post_ra>
